<compile_context>
chip_gen: v7x
topology: tpu7x:2x2x1
jax: 0.10.0
libtpu: 0.0.40
codegen_flags: <defaults>
</compile_context>

<pallas_src>
import functools

import jax
import jax.numpy as jnp
from jax.experimental import pallas as pl
from jax.experimental.pallas import tpu as pltpu


# ----------------------------------------------------------------------------
# Fused forward kernel (K-tiled backbone matmul + epilogue on last tile)
# ----------------------------------------------------------------------------
def _fused_forward_kernel(
    x_clip_ref, x_frame_ref,
    w_bb_ref, b_bb_ref,
    w_base_ref, b_base_ref,
    w_in_ref, b_in_ref,
    w_out_ref, b_out_ref,
    w_fc1_ref, b_fc1_ref,
    w_fc2_ref, b_fc2_ref,
    w_fc3_ref, b_fc3_ref,
    o_ref,
    acc_ref,
    *, num_heads, head_dim, embed_dim):
  f32 = jnp.float32
  bf16 = jnp.bfloat16
  k = pl.program_id(0)

  # --- out_rnn = self.backbone(x): R3D-18 stand-in, K-tiled over the grid ----
  @pl.when(k == 0)
  def _():
    acc_ref[...] = jnp.zeros_like(acc_ref)

  acc_ref[...] += jnp.dot(x_clip_ref[...], w_bb_ref[...],
                          preferred_element_type=f32)

  # --- epilogue: per-frame proj + MHA + MLP head, only on the final K tile ---
  @pl.when(k == pl.num_programs(0) - 1)
  def _():
    E, hd = embed_dim, head_dim
    out_rnn = acc_ref[...] + b_bb_ref[...]                              # (b,E)

    # per-frame baseline (ResNet-18 stand-in), LAST frame only: only
    # out_att[:, -1] feeds the output, so only frame l-1 features matter.
    seq = jnp.dot(x_frame_ref[...], w_base_ref[...],
                  preferred_element_type=f32) + b_base_ref[...]         # (b,E)
    seq_bf = seq.astype(bf16)

    # nn.MultiheadAttention (batch_first=False), batch element l-1:
    # one packed in_proj matmul (N=3E), per-head softmax(QK^T)V on the tiny
    # (b,b) score matrix, lane-dense head concat, one (E,E) out_proj matmul.
    qkv = jnp.dot(seq_bf, w_in_ref[...],
                  preferred_element_type=f32) + b_in_ref[...]           # (b,3E)
    scale = float(head_dim) ** -0.5
    heads = []
    for hh in range(num_heads):
      qh = (qkv[:, hh * hd:(hh + 1) * hd] * scale).astype(bf16)   # pre-scale q
      kh = qkv[:, E + hh * hd:E + (hh + 1) * hd].astype(bf16)
      vh = qkv[:, 2 * E + hh * hd:2 * E + (hh + 1) * hd].astype(bf16)
      s = jax.lax.dot_general(qh, kh, (((1,), (1,)), ((), ())),
                              preferred_element_type=f32)               # (b,b)
      m = jnp.max(s, axis=-1, keepdims=True)
      e = jnp.exp(s - m)
      p = e * pl.reciprocal(jnp.sum(e, axis=-1, keepdims=True), approx=True)
      heads.append(jnp.dot(p.astype(bf16), vh,
                           preferred_element_type=f32))                 # (b,hd)
    ctx = jnp.concatenate(heads, axis=-1).astype(bf16)                  # (b,E)
    att = jnp.dot(ctx, w_out_ref[...],
                  preferred_element_type=f32) + b_out_ref[...]          # (b,E)

    # torch.cat([out_rnn, out_att], dim=1) folded into fc1's two weight slabs.
    # TODO(synk): MLP class not shown in source; assumed Linear+ReLU(+Dropout)
    # hidden layers and a plain final Linear (dropout is eval-mode identity).
    h1 = (jnp.dot(out_rnn.astype(bf16), w_fc1_ref[0],
                  preferred_element_type=f32)
          + jnp.dot(att.astype(bf16), w_fc1_ref[1],
                    preferred_element_type=f32)
          + b_fc1_ref[...])
    h1 = jnp.maximum(h1, 0.0)
    h2 = jnp.dot(h1.astype(bf16), w_fc2_ref[...],
                 preferred_element_type=f32) + b_fc2_ref[...]
    h2 = jnp.maximum(h2, 0.0)
    logits = jnp.dot(h2.astype(bf16), w_fc3_ref[...],
                     preferred_element_type=f32) + b_fc3_ref[...]       # (b,ncp)
    o_ref[...] = logits.astype(o_ref.dtype)


# ----------------------------------------------------------------------------
# Parameters (deterministic, in-script init) + kernel-layout packing
# ----------------------------------------------------------------------------
def init_params(key, c, l, h, w, embed_dim, num_heads, num_classes):
  """Stand-in parameters in PyTorch-like (x @ W) layout, f32."""
  del num_heads  # head split happens in-kernel via static lane slices
  E = embed_dim
  ks = jax.random.split(key, 8)

  def lin(k, fan_in, fan_out):
    return jax.random.normal(k, (fan_in, fan_out), jnp.float32) * (
        1.0 / jnp.sqrt(float(fan_in)))

  return {
      # TODO(synk): pretrained r3d_18 video backbone not reimplemented;
      # stand-in = linear projection of the flattened clip to embed_dim.
      "w_backbone": lin(ks[0], c * l * h * w, E),
      "b_backbone": jnp.zeros((E,), jnp.float32),
      # TODO(synk): pretrained ResNet-18 per-frame backbone not reimplemented;
      # stand-in = linear projection of a flattened frame to embed_dim.
      "w_baseline": lin(ks[1], c * h * w, E),
      "b_baseline": jnp.zeros((E,), jnp.float32),
      # nn.MultiheadAttention packed in_proj (E -> 3E, columns [q|k|v]) and
      # out_proj (E -> E).
      "w_in_proj": lin(ks[2], E, 3 * E),
      "b_in_proj": jnp.zeros((3 * E,), jnp.float32),
      "w_out_proj": lin(ks[3], E, E),
      "b_out_proj": jnp.zeros((E,), jnp.float32),
      # MLP head, structurally [2E, E, E//2, num_classes]
      # (original fixed [1024, 512, 256, num_classes] with E=512).
      "w_fc1": lin(ks[4], 2 * E, E),
      "b_fc1": jnp.zeros((E,), jnp.float32),
      "w_fc2": lin(ks[5], E, E // 2),
      "b_fc2": jnp.zeros((E // 2,), jnp.float32),
      "w_fc3": lin(ks[6], E // 2, num_classes),
      "b_fc3": jnp.zeros((num_classes,), jnp.float32),
  }


def pack_params(p):
  """Cast weights to bf16 and reshape so the fused kernel only indexes leading
  dims / static lane slices (no in-kernel transposes). Biases stay f32.
  TODO(synk): optional int8 (v5e/v6e) / fp8 (v7x) quantization of
  w_backbone/w_baseline with per-column scales would halve the dominant DMA."""
  f32, bf16 = jnp.float32, jnp.bfloat16
  E = p["w_in_proj"].shape[0]
  nc = p["w_fc3"].shape[1]
  ncp = max(128, ((nc + 127) // 128) * 128)  # lane-dense padded logits width

  w_fc3p = jnp.zeros((E // 2, ncp), f32).at[:, :nc].set(p["w_fc3"])
  b_fc3p = jnp.zeros((1, ncp), f32).at[:, :nc].set(p["b_fc3"][None, :])

  return {
      "w_backbone": p["w_backbone"].astype(bf16),
      "b_backbone": p["b_backbone"].reshape(1, E),
      "w_baseline": p["w_baseline"].astype(bf16),
      "b_baseline": p["b_baseline"].reshape(1, E),
      # packed in_proj kept as one (E, 3E) slab -> single N=3E matmul.
      "w_in_proj": p["w_in_proj"].astype(bf16),
      "b_in_proj": p["b_in_proj"].reshape(1, 3 * E),
      "w_out_proj": p["w_out_proj"].astype(bf16),
      "b_out_proj": p["b_out_proj"].reshape(1, E),
      # (2E, E) -> (2, E, E): [0] multiplies out_rnn, [1] multiplies out_att,
      # folding torch.cat into two partial matmuls.
      "w_fc1": p["w_fc1"].reshape(2, E, E).astype(bf16),
      "b_fc1": p["b_fc1"].reshape(1, E),
      "w_fc2": p["w_fc2"].astype(bf16),
      "b_fc2": p["b_fc2"].reshape(1, E // 2),
      "w_fc3": w_fc3p.astype(bf16),
      "b_fc3": b_fc3p,
  }


# ----------------------------------------------------------------------------
# Forward pass (mirrors BaselineRNN.forward)
# ----------------------------------------------------------------------------
def _pick_k_tile(K, target=2048):
  """Largest 128-multiple divisor of K not exceeding `target` (else K)."""
  if K <= target:
    return K
  cand = (target // 128) * 128
  while cand >= 128:
    if K % cand == 0:
      return cand
    cand -= 128
  return K


def baseline_rnn_forward(x, wp, *, num_heads, num_classes, k_tile_target=2048):
  # layout: x = (b, c, l, h, w)  (NCDHW)
  b, c, l, h, w = x.shape
  E = wp["w_backbone"].shape[1]
  hd = E // num_heads
  ncp = wp["w_fc3"].shape[1]
  K = c * l * h * w
  chw = c * h * w

  # activations cast to bf16 in the wrapper (halves the activation HBM stream);
  # backbone input: whole clip flattened (free reshape, no transpose).
  x_clip = x.reshape(b, K).astype(jnp.bfloat16)
  # x.permute(0,2,1,3,4): per-frame features in (c,h,w) order; only frame l-1
  # is ever consumed (out_att[:, -1]), so slice it directly from NCDHW.
  x_frame = x[:, :, l - 1, :, :].reshape(b, chw).astype(jnp.bfloat16)

  tk = _pick_k_tile(K, k_tile_target)
  nk = K // tk

  args = (
      x_clip, x_frame,
      wp["w_backbone"], wp["b_backbone"],
      wp["w_baseline"], wp["b_baseline"],
      wp["w_in_proj"], wp["b_in_proj"],
      wp["w_out_proj"], wp["b_out_proj"],
      wp["w_fc1"], wp["b_fc1"],
      wp["w_fc2"], wp["b_fc2"],
      wp["w_fc3"], wp["b_fc3"],
  )

  def _resident(a):
    nd = a.ndim
    return pl.BlockSpec(a.shape, lambda k, _nd=nd: (0,) * _nd)

  in_specs = [
      pl.BlockSpec((b, tk), lambda k: (0, k)),      # x_clip: K-tiled
      _resident(x_frame),
      pl.BlockSpec((tk, E), lambda k: (k, 0)),      # w_backbone: K-tiled
  ] + [_resident(a) for a in args[3:]]

  flops = (
      2 * b * K * E                     # backbone projection
      + 2 * b * chw * E                 # per-frame baseline projection
      + 2 * b * E * 3 * E               # MHA in_proj
      + num_heads * 4 * b * b * hd      # QK^T + PV
      + 2 * b * E * E                   # MHA out_proj
      + 2 * b * (2 * E) * E             # fc1 (concat-folded)
      + 2 * b * E * (E // 2)            # fc2
      + 2 * b * (E // 2) * ncp          # fc3
  )
  transcendentals = num_heads * b * b   # softmax exps
  bytes_accessed = (sum(int(a.size) * a.dtype.itemsize for a in args)
                    + b * ncp * 4)

  kernel = functools.partial(_fused_forward_kernel,
                             num_heads=num_heads, head_dim=hd, embed_dim=E)
  logits_pad = pl.pallas_call(
      kernel,
      out_shape=jax.ShapeDtypeStruct((b, ncp), jnp.float32),
      grid_spec=pltpu.PrefetchScalarGridSpec(
          num_scalar_prefetch=0,
          grid=(nk,),
          in_specs=in_specs,
          out_specs=pl.BlockSpec((b, ncp), lambda k: (0, 0)),
          scratch_shapes=[pltpu.VMEM((b, E), jnp.float32)]),
      compiler_params=pltpu.CompilerParams(
          dimension_semantics=("arbitrary",)),   # K axis is a reduction
      cost_estimate=pl.CostEstimate(flops=flops,
                                    transcendentals=transcendentals,
                                    bytes_accessed=bytes_accessed),
  )(*args)
  return logits_pad[:, :num_classes]


# ----------------------------------------------------------------------------
if __name__ == "__main__":
  # batch raised 2 -> 8 per perf review: fills a sublane group and amortizes
  # the per-call weight stream.  (The MHA couples batch samples — batch dim is
  # its attention sequence — so the whole batch must live in one call.)
  b, c, l, h, w = 8, 3, 8, 16, 16
  embed_dim, num_heads, num_classes = 128, 2, 8

  key = jax.random.PRNGKey(0)
  kx, kp = jax.random.split(key)
  x = jax.random.normal(kx, (b, c, l, h, w), dtype=jnp.float32)

  params = init_params(kp, c, l, h, w, embed_dim, num_heads, num_classes)
  packed = pack_params(params)

  fwd = jax.jit(functools.partial(baseline_rnn_forward,
                                  num_heads=num_heads,
                                  num_classes=num_classes))
  out = fwd(x, packed)
  out = jax.block_until_ready(out)
  assert out.shape == (b, num_classes), out.shape
  assert jnp.all(jnp.isfinite(out))
  print("KERNEL_OK")
</pallas_src>

<mosaic_0001>
module attributes {stable_mosaic.version = 11 : i64} {
  func.func @_fused_forward_kernel(%arg0: i32, %arg1: memref<8x2048xbf16, #tpu.memory_space<vmem>>, %arg2: memref<8x768xbf16, #tpu.memory_space<vmem>>, %arg3: memref<2048x128xbf16, #tpu.memory_space<vmem>>, %arg4: memref<1x128xf32, #tpu.memory_space<vmem>>, %arg5: memref<768x128xbf16, #tpu.memory_space<vmem>>, %arg6: memref<1x128xf32, #tpu.memory_space<vmem>>, %arg7: memref<128x384xbf16, #tpu.memory_space<vmem>>, %arg8: memref<1x384xf32, #tpu.memory_space<vmem>>, %arg9: memref<128x128xbf16, #tpu.memory_space<vmem>>, %arg10: memref<1x128xf32, #tpu.memory_space<vmem>>, %arg11: memref<2x128x128xbf16, #tpu.memory_space<vmem>>, %arg12: memref<1x128xf32, #tpu.memory_space<vmem>>, %arg13: memref<128x64xbf16, #tpu.memory_space<vmem>>, %arg14: memref<1x64xf32, #tpu.memory_space<vmem>>, %arg15: memref<64x128xbf16, #tpu.memory_space<vmem>>, %arg16: memref<1x128xf32, #tpu.memory_space<vmem>>, %arg17: memref<8x128xf32, #tpu.memory_space<vmem>>, %arg18: memref<8x128xf32, #tpu.memory_space<vmem>>) attributes {dimension_semantics = [#tpu.dimension_semantics<arbitrary>], iteration_bounds = array<i64: 3>, scalar_prefetch = 0 : i64, scratch_operands = 1 : i64, tpu.core_type = #tpu.core_type<tc>, window_params = [{transform_indices = @transform_0, window_bounds = array<i64: 8, 2048>}, {pipeline_mode = #tpu.pipeline_mode<synchronous>, transform_indices = @transform_1, window_bounds = array<i64: 8, 768>}, {transform_indices = @transform_2, window_bounds = array<i64: 2048, 128>}, {pipeline_mode = #tpu.pipeline_mode<synchronous>, transform_indices = @transform_3, window_bounds = array<i64: 1, 128>}, {pipeline_mode = #tpu.pipeline_mode<synchronous>, transform_indices = @transform_4, window_bounds = array<i64: 768, 128>}, {pipeline_mode = #tpu.pipeline_mode<synchronous>, transform_indices = @transform_5, window_bounds = array<i64: 1, 128>}, {pipeline_mode = #tpu.pipeline_mode<synchronous>, transform_indices = @transform_6, window_bounds = array<i64: 128, 384>}, {pipeline_mode = #tpu.pipeline_mode<synchronous>, transform_indices = @transform_7, window_bounds = array<i64: 1, 384>}, {pipeline_mode = #tpu.pipeline_mode<synchronous>, transform_indices = @transform_8, window_bounds = array<i64: 128, 128>}, {pipeline_mode = #tpu.pipeline_mode<synchronous>, transform_indices = @transform_9, window_bounds = array<i64: 1, 128>}, {pipeline_mode = #tpu.pipeline_mode<synchronous>, transform_indices = @transform_10, window_bounds = array<i64: 2, 128, 128>}, {pipeline_mode = #tpu.pipeline_mode<synchronous>, transform_indices = @transform_11, window_bounds = array<i64: 1, 128>}, {pipeline_mode = #tpu.pipeline_mode<synchronous>, transform_indices = @transform_12, window_bounds = array<i64: 128, 64>}, {pipeline_mode = #tpu.pipeline_mode<synchronous>, transform_indices = @transform_13, window_bounds = array<i64: 1, 64>}, {pipeline_mode = #tpu.pipeline_mode<synchronous>, transform_indices = @transform_14, window_bounds = array<i64: 64, 128>}, {pipeline_mode = #tpu.pipeline_mode<synchronous>, transform_indices = @transform_15, window_bounds = array<i64: 1, 128>}, {pipeline_mode = #tpu.pipeline_mode<synchronous>, transform_indices = @transform_16, window_bounds = array<i64: 8, 128>}]} {
    %c0_i32 = arith.constant 0 : i32
    %0 = arith.cmpi eq, %arg0, %c0_i32 : i32
    %1 = arith.extui %0 : i1 to i32
    %c0_i32_0 = arith.constant 0 : i32
    %2 = arith.cmpi ne, %1, %c0_i32_0 : i32
    scf.if %2 {
      %cst_9 = arith.constant 0.000000e+00 : f32
      %12 = vector.broadcast %cst_9 : f32 to vector<8x128xf32>
      %c0_10 = arith.constant 0 : index
      %c0_11 = arith.constant 0 : index
      %13 = vector.load %arg18[%c0_10, %c0_11] : memref<8x128xf32, #tpu.memory_space<vmem>>, vector<8x128xf32>
      tpu.vector_store %arg18[%c0_10, %c0_11], %12 {strides = array<i32>} : memref<8x128xf32, #tpu.memory_space<vmem>>, vector<8x128xf32>,
    } else {
    }
    %c0 = arith.constant 0 : index
    %c0_1 = arith.constant 0 : index
    %3 = vector.load %arg18[%c0, %c0_1] : memref<8x128xf32, #tpu.memory_space<vmem>>, vector<8x128xf32>
    %c0_2 = arith.constant 0 : index
    %c0_3 = arith.constant 0 : index
    %4 = vector.load %arg1[%c0_2, %c0_3] : memref<8x2048xbf16, #tpu.memory_space<vmem>>, vector<8x2048xbf16>
    %c0_4 = arith.constant 0 : index
    %c0_5 = arith.constant 0 : index
    %5 = vector.load %arg3[%c0_4, %c0_5] : memref<2048x128xbf16, #tpu.memory_space<vmem>>, vector<2048x128xbf16>
    %cst = arith.constant dense<0.000000e+00> : vector<8x128xf32>
    %6 = tpu.matmul %4, %5, %cst {dimension_numbers = #tpu.dot_dimension_numbers<[1], [0], [0], [1], [0, 0, 1, 1], [], []>} : vector<8x2048xbf16>, vector<2048x128xbf16>, vector<8x128xf32> -> vector<8x128xf32>
    %7 = arith.addf %3, %6 : vector<8x128xf32>
    %c0_6 = arith.constant 0 : index
    %c0_7 = arith.constant 0 : index
    %8 = vector.load %arg18[%c0_6, %c0_7] : memref<8x128xf32, #tpu.memory_space<vmem>>, vector<8x128xf32>
    tpu.vector_store %arg18[%c0_6, %c0_7], %7 {strides = array<i32>} : memref<8x128xf32, #tpu.memory_space<vmem>>, vector<8x128xf32>,
    %c2_i32 = arith.constant 2 : i32
    %9 = arith.cmpi eq, %arg0, %c2_i32 : i32
    %10 = arith.extui %9 : i1 to i32
    %c0_i32_8 = arith.constant 0 : i32
    %11 = arith.cmpi ne, %10, %c0_i32_8 : i32
    scf.if %11 {
      %c0_9 = arith.constant 0 : index
      %c0_10 = arith.constant 0 : index
      %12 = vector.load %arg18[%c0_9, %c0_10] : memref<8x128xf32, #tpu.memory_space<vmem>>, vector<8x128xf32>
      %c0_11 = arith.constant 0 : index
      %c0_12 = arith.constant 0 : index
      %13 = vector.load %arg4[%c0_11, %c0_12] : memref<1x128xf32, #tpu.memory_space<vmem>>, vector<1x128xf32>
      %14 = vector.broadcast %13 : vector<1x128xf32> to vector<8x128xf32>
      %15 = arith.addf %12, %14 : vector<8x128xf32>
      %c0_13 = arith.constant 0 : index
      %c0_14 = arith.constant 0 : index
      %16 = vector.load %arg2[%c0_13, %c0_14] : memref<8x768xbf16, #tpu.memory_space<vmem>>, vector<8x768xbf16>
      %c0_15 = arith.constant 0 : index
      %c0_16 = arith.constant 0 : index
      %17 = vector.load %arg5[%c0_15, %c0_16] : memref<768x128xbf16, #tpu.memory_space<vmem>>, vector<768x128xbf16>
      %cst_17 = arith.constant dense<0.000000e+00> : vector<8x128xf32>
      %18 = tpu.matmul %16, %17, %cst_17 {dimension_numbers = #tpu.dot_dimension_numbers<[1], [0], [0], [1], [0, 0, 1, 1], [], []>} : vector<8x768xbf16>, vector<768x128xbf16>, vector<8x128xf32> -> vector<8x128xf32>
      %c0_18 = arith.constant 0 : index
      %c0_19 = arith.constant 0 : index
      %19 = vector.load %arg6[%c0_18, %c0_19] : memref<1x128xf32, #tpu.memory_space<vmem>>, vector<1x128xf32>
      %20 = vector.broadcast %19 : vector<1x128xf32> to vector<8x128xf32>
      %21 = arith.addf %18, %20 : vector<8x128xf32>
      %22 = arith.truncf %21 : vector<8x128xf32> to vector<8x128xbf16>
      %c0_20 = arith.constant 0 : index
      %c0_21 = arith.constant 0 : index
      %23 = vector.load %arg7[%c0_20, %c0_21] : memref<128x384xbf16, #tpu.memory_space<vmem>>, vector<128x384xbf16>
      %cst_22 = arith.constant dense<0.000000e+00> : vector<8x384xf32>
      %24 = tpu.matmul %22, %23, %cst_22 {dimension_numbers = #tpu.dot_dimension_numbers<[1], [0], [0], [1], [0, 0, 1, 1], [], []>} : vector<8x128xbf16>, vector<128x384xbf16>, vector<8x384xf32> -> vector<8x384xf32>
      %c0_23 = arith.constant 0 : index
      %c0_24 = arith.constant 0 : index
      %25 = vector.load %arg8[%c0_23, %c0_24] : memref<1x384xf32, #tpu.memory_space<vmem>>, vector<1x384xf32>
      %26 = vector.broadcast %25 : vector<1x384xf32> to vector<8x384xf32>
      %27 = arith.addf %24, %26 : vector<8x384xf32>
      %28 = vector.extract_strided_slice %27 {offsets = [0, 0], sizes = [8, 64], strides = [1, 1]} : vector<8x384xf32> to vector<8x64xf32>
      %cst_25 = arith.constant 1.250000e-01 : f32
      %29 = vector.broadcast %cst_25 : f32 to vector<8x64xf32>
      %30 = arith.mulf %28, %29 : vector<8x64xf32>
      %31 = arith.truncf %30 : vector<8x64xf32> to vector<8x64xbf16>
      %32 = vector.extract_strided_slice %27 {offsets = [0, 128], sizes = [8, 64], strides = [1, 1]} : vector<8x384xf32> to vector<8x64xf32>
      %33 = arith.truncf %32 : vector<8x64xf32> to vector<8x64xbf16>
      %34 = vector.extract_strided_slice %27 {offsets = [0, 256], sizes = [8, 64], strides = [1, 1]} : vector<8x384xf32> to vector<8x64xf32>
      %35 = arith.truncf %34 : vector<8x64xf32> to vector<8x64xbf16>
      %cst_26 = arith.constant dense<0.000000e+00> : vector<8x8xf32>
      %36 = tpu.matmul %31, %33, %cst_26 {dimension_numbers = #tpu.dot_dimension_numbers<[1], [1], [0], [0], [0, 0, 1, 0], [], []>} : vector<8x64xbf16>, vector<8x64xbf16>, vector<8x8xf32> -> vector<8x8xf32>
      %cst_27 = arith.constant dense<0xFF800000> : vector<8xf32>
      %37 = vector.multi_reduction <maximumf>, %36, %cst_27 [1] : vector<8x8xf32> to vector<8xf32>
      %38 = vector.shape_cast %37 : vector<8xf32> to vector<8x1xf32>
      %39 = vector.broadcast %38 : vector<8x1xf32> to vector<8x8xf32>
      %40 = arith.subf %36, %39 : vector<8x8xf32>
      %41 = math.exp %40 : vector<8x8xf32>
      %cst_28 = arith.constant dense<0.000000e+00> : vector<8xf32>
      %42 = vector.multi_reduction <add>, %41, %cst_28 [1] : vector<8x8xf32> to vector<8xf32>
      %43 = vector.shape_cast %42 : vector<8xf32> to vector<8x1xf32>
      %44 = tpu.reciprocal %43 {approx = true} : vector<8x1xf32> -> vector<8x1xf32>
      %45 = vector.broadcast %44 : vector<8x1xf32> to vector<8x8xf32>
      %46 = arith.mulf %41, %45 : vector<8x8xf32>
      %47 = arith.truncf %46 : vector<8x8xf32> to vector<8x8xbf16>
      %cst_29 = arith.constant dense<0.000000e+00> : vector<8x64xf32>
      %48 = tpu.matmul %47, %35, %cst_29 {dimension_numbers = #tpu.dot_dimension_numbers<[1], [0], [0], [1], [0, 0, 1, 1], [], []>} : vector<8x8xbf16>, vector<8x64xbf16>, vector<8x64xf32> -> vector<8x64xf32>
      %49 = vector.extract_strided_slice %27 {offsets = [0, 64], sizes = [8, 64], strides = [1, 1]} : vector<8x384xf32> to vector<8x64xf32>
      %cst_30 = arith.constant 1.250000e-01 : f32
      %50 = vector.broadcast %cst_30 : f32 to vector<8x64xf32>
      %51 = arith.mulf %49, %50 : vector<8x64xf32>
      %52 = arith.truncf %51 : vector<8x64xf32> to vector<8x64xbf16>
      %53 = vector.extract_strided_slice %27 {offsets = [0, 192], sizes = [8, 64], strides = [1, 1]} : vector<8x384xf32> to vector<8x64xf32>
      %54 = arith.truncf %53 : vector<8x64xf32> to vector<8x64xbf16>
      %55 = vector.extract_strided_slice %27 {offsets = [0, 320], sizes = [8, 64], strides = [1, 1]} : vector<8x384xf32> to vector<8x64xf32>
      %56 = arith.truncf %55 : vector<8x64xf32> to vector<8x64xbf16>
      %cst_31 = arith.constant dense<0.000000e+00> : vector<8x8xf32>
      %57 = tpu.matmul %52, %54, %cst_31 {dimension_numbers = #tpu.dot_dimension_numbers<[1], [1], [0], [0], [0, 0, 1, 0], [], []>} : vector<8x64xbf16>, vector<8x64xbf16>, vector<8x8xf32> -> vector<8x8xf32>
      %cst_32 = arith.constant dense<0xFF800000> : vector<8xf32>
      %58 = vector.multi_reduction <maximumf>, %57, %cst_32 [1] : vector<8x8xf32> to vector<8xf32>
      %59 = vector.shape_cast %58 : vector<8xf32> to vector<8x1xf32>
      %60 = vector.broadcast %59 : vector<8x1xf32> to vector<8x8xf32>
      %61 = arith.subf %57, %60 : vector<8x8xf32>
      %62 = math.exp %61 : vector<8x8xf32>
      %cst_33 = arith.constant dense<0.000000e+00> : vector<8xf32>
      %63 = vector.multi_reduction <add>, %62, %cst_33 [1] : vector<8x8xf32> to vector<8xf32>
      %64 = vector.shape_cast %63 : vector<8xf32> to vector<8x1xf32>
      %65 = tpu.reciprocal %64 {approx = true} : vector<8x1xf32> -> vector<8x1xf32>
      %66 = vector.broadcast %65 : vector<8x1xf32> to vector<8x8xf32>
      %67 = arith.mulf %62, %66 : vector<8x8xf32>
      %68 = arith.truncf %67 : vector<8x8xf32> to vector<8x8xbf16>
      %cst_34 = arith.constant dense<0.000000e+00> : vector<8x64xf32>
      %69 = tpu.matmul %68, %56, %cst_34 {dimension_numbers = #tpu.dot_dimension_numbers<[1], [0], [0], [1], [0, 0, 1, 1], [], []>} : vector<8x8xbf16>, vector<8x64xbf16>, vector<8x64xf32> -> vector<8x64xf32>
      %70 = tpu.concatenate %48, %69 in 1 : vector<8x64xf32>, vector<8x64xf32> -> vector<8x128xf32>
      %71 = arith.truncf %70 : vector<8x128xf32> to vector<8x128xbf16>
      %c0_35 = arith.constant 0 : index
      %c0_36 = arith.constant 0 : index
      %72 = vector.load %arg9[%c0_35, %c0_36] : memref<128x128xbf16, #tpu.memory_space<vmem>>, vector<128x128xbf16>
      %cst_37 = arith.constant dense<0.000000e+00> : vector<8x128xf32>
      %73 = tpu.matmul %71, %72, %cst_37 {dimension_numbers = #tpu.dot_dimension_numbers<[1], [0], [0], [1], [0, 0, 1, 1], [], []>} : vector<8x128xbf16>, vector<128x128xbf16>, vector<8x128xf32> -> vector<8x128xf32>
      %c0_38 = arith.constant 0 : index
      %c0_39 = arith.constant 0 : index
      %74 = vector.load %arg10[%c0_38, %c0_39] : memref<1x128xf32, #tpu.memory_space<vmem>>, vector<1x128xf32>
      %75 = vector.broadcast %74 : vector<1x128xf32> to vector<8x128xf32>
      %76 = arith.addf %73, %75 : vector<8x128xf32>
      %77 = arith.truncf %15 : vector<8x128xf32> to vector<8x128xbf16>
      %c0_40 = arith.constant 0 : index
      %c0_41 = arith.constant 0 : index
      %c0_42 = arith.constant 0 : index
      %78 = vector.load %arg11[%c0_40, %c0_41, %c0_42] : memref<2x128x128xbf16, #tpu.memory_space<vmem>>, vector<1x128x128xbf16>
      %79 = vector.shape_cast %78 : vector<1x128x128xbf16> to vector<128x128xbf16>
      %cst_43 = arith.constant dense<0.000000e+00> : vector<8x128xf32>
      %80 = tpu.matmul %77, %79, %cst_43 {dimension_numbers = #tpu.dot_dimension_numbers<[1], [0], [0], [1], [0, 0, 1, 1], [], []>} : vector<8x128xbf16>, vector<128x128xbf16>, vector<8x128xf32> -> vector<8x128xf32>
      %81 = arith.truncf %76 : vector<8x128xf32> to vector<8x128xbf16>
      %c1 = arith.constant 1 : index
      %c0_44 = arith.constant 0 : index
      %c0_45 = arith.constant 0 : index
      %82 = vector.load %arg11[%c1, %c0_44, %c0_45] : memref<2x128x128xbf16, #tpu.memory_space<vmem>>, vector<1x128x128xbf16>
      %83 = vector.shape_cast %82 : vector<1x128x128xbf16> to vector<128x128xbf16>
      %cst_46 = arith.constant dense<0.000000e+00> : vector<8x128xf32>
      %84 = tpu.matmul %81, %83, %cst_46 {dimension_numbers = #tpu.dot_dimension_numbers<[1], [0], [0], [1], [0, 0, 1, 1], [], []>} : vector<8x128xbf16>, vector<128x128xbf16>, vector<8x128xf32> -> vector<8x128xf32>
      %85 = arith.addf %80, %84 : vector<8x128xf32>
      %c0_47 = arith.constant 0 : index
      %c0_48 = arith.constant 0 : index
      %86 = vector.load %arg12[%c0_47, %c0_48] : memref<1x128xf32, #tpu.memory_space<vmem>>, vector<1x128xf32>
      %87 = vector.broadcast %86 : vector<1x128xf32> to vector<8x128xf32>
      %88 = arith.addf %85, %87 : vector<8x128xf32>
      %cst_49 = arith.constant 0.000000e+00 : f32
      %89 = vector.broadcast %cst_49 : f32 to vector<8x128xf32>
      %90 = arith.maximumf %88, %89 : vector<8x128xf32>
      %91 = arith.truncf %90 : vector<8x128xf32> to vector<8x128xbf16>
      %c0_50 = arith.constant 0 : index
      %c0_51 = arith.constant 0 : index
      %92 = vector.load %arg13[%c0_50, %c0_51] : memref<128x64xbf16, #tpu.memory_space<vmem>>, vector<128x64xbf16>
      %cst_52 = arith.constant dense<0.000000e+00> : vector<8x64xf32>
      %93 = tpu.matmul %91, %92, %cst_52 {dimension_numbers = #tpu.dot_dimension_numbers<[1], [0], [0], [1], [0, 0, 1, 1], [], []>} : vector<8x128xbf16>, vector<128x64xbf16>, vector<8x64xf32> -> vector<8x64xf32>
      %c0_53 = arith.constant 0 : index
      %c0_54 = arith.constant 0 : index
      %94 = vector.load %arg14[%c0_53, %c0_54] : memref<1x64xf32, #tpu.memory_space<vmem>>, vector<1x64xf32>
      %95 = vector.broadcast %94 : vector<1x64xf32> to vector<8x64xf32>
      %96 = arith.addf %93, %95 : vector<8x64xf32>
      %cst_55 = arith.constant 0.000000e+00 : f32
      %97 = vector.broadcast %cst_55 : f32 to vector<8x64xf32>
      %98 = arith.maximumf %96, %97 : vector<8x64xf32>
      %99 = arith.truncf %98 : vector<8x64xf32> to vector<8x64xbf16>
      %c0_56 = arith.constant 0 : index
      %c0_57 = arith.constant 0 : index
      %100 = vector.load %arg15[%c0_56, %c0_57] : memref<64x128xbf16, #tpu.memory_space<vmem>>, vector<64x128xbf16>
      %cst_58 = arith.constant dense<0.000000e+00> : vector<8x128xf32>
      %101 = tpu.matmul %99, %100, %cst_58 {dimension_numbers = #tpu.dot_dimension_numbers<[1], [0], [0], [1], [0, 0, 1, 1], [], []>} : vector<8x64xbf16>, vector<64x128xbf16>, vector<8x128xf32> -> vector<8x128xf32>
      %c0_59 = arith.constant 0 : index
      %c0_60 = arith.constant 0 : index
      %102 = vector.load %arg16[%c0_59, %c0_60] : memref<1x128xf32, #tpu.memory_space<vmem>>, vector<1x128xf32>
      %103 = vector.broadcast %102 : vector<1x128xf32> to vector<8x128xf32>
      %104 = arith.addf %101, %103 : vector<8x128xf32>
      %c0_61 = arith.constant 0 : index
      %c0_62 = arith.constant 0 : index
      %105 = vector.load %arg17[%c0_61, %c0_62] : memref<8x128xf32, #tpu.memory_space<vmem>>, vector<8x128xf32>
      tpu.vector_store %arg17[%c0_61, %c0_62], %104 {strides = array<i32>} : memref<8x128xf32, #tpu.memory_space<vmem>>, vector<8x128xf32>,
    } else {
    }
    return
  }
  func.func @transform_0(%arg0: i32) -> (i32, i32) {
    %c0_i32 = arith.constant 0 : i32
    %c0_i32_0 = arith.constant 0 : i32
    return %c0_i32, %arg0 : i32, i32
  }
  func.func @transform_1(%arg0: i32) -> (i32, i32) {
    %c0_i32 = arith.constant 0 : i32
    %c0_i32_0 = arith.constant 0 : i32
    %c0_i32_1 = arith.constant 0 : i32
    return %c0_i32, %c0_i32_0 : i32, i32
  }
  func.func @transform_2(%arg0: i32) -> (i32, i32) {
    %c0_i32 = arith.constant 0 : i32
    %c0_i32_0 = arith.constant 0 : i32
    return %arg0, %c0_i32 : i32, i32
  }
  func.func @transform_3(%arg0: i32) -> (i32, i32) {
    %c0_i32 = arith.constant 0 : i32
    %c0_i32_0 = arith.constant 0 : i32
    %c0_i32_1 = arith.constant 0 : i32
    return %c0_i32, %c0_i32_0 : i32, i32
  }
  func.func @transform_4(%arg0: i32) -> (i32, i32) {
    %c0_i32 = arith.constant 0 : i32
    %c0_i32_0 = arith.constant 0 : i32
    %c0_i32_1 = arith.constant 0 : i32
    return %c0_i32, %c0_i32_0 : i32, i32
  }
  func.func @transform_5(%arg0: i32) -> (i32, i32) {
    %c0_i32 = arith.constant 0 : i32
    %c0_i32_0 = arith.constant 0 : i32
    %c0_i32_1 = arith.constant 0 : i32
    return %c0_i32, %c0_i32_0 : i32, i32
  }
  func.func @transform_6(%arg0: i32) -> (i32, i32) {
    %c0_i32 = arith.constant 0 : i32
    %c0_i32_0 = arith.constant 0 : i32
    %c0_i32_1 = arith.constant 0 : i32
    return %c0_i32, %c0_i32_0 : i32, i32
  }
  func.func @transform_7(%arg0: i32) -> (i32, i32) {
    %c0_i32 = arith.constant 0 : i32
    %c0_i32_0 = arith.constant 0 : i32
    %c0_i32_1 = arith.constant 0 : i32
    return %c0_i32, %c0_i32_0 : i32, i32
  }
  func.func @transform_8(%arg0: i32) -> (i32, i32) {
    %c0_i32 = arith.constant 0 : i32
    %c0_i32_0 = arith.constant 0 : i32
    %c0_i32_1 = arith.constant 0 : i32
    return %c0_i32, %c0_i32_0 : i32, i32
  }
  func.func @transform_9(%arg0: i32) -> (i32, i32) {
    %c0_i32 = arith.constant 0 : i32
    %c0_i32_0 = arith.constant 0 : i32
    %c0_i32_1 = arith.constant 0 : i32
    return %c0_i32, %c0_i32_0 : i32, i32
  }
  func.func @transform_10(%arg0: i32) -> (i32, i32, i32) {
    %c0_i32 = arith.constant 0 : i32
    %c0_i32_0 = arith.constant 0 : i32
    %c0_i32_1 = arith.constant 0 : i32
    %c0_i32_2 = arith.constant 0 : i32
    return %c0_i32, %c0_i32_0, %c0_i32_1 : i32, i32, i32
  }
  func.func @transform_11(%arg0: i32) -> (i32, i32) {
    %c0_i32 = arith.constant 0 : i32
    %c0_i32_0 = arith.constant 0 : i32
    %c0_i32_1 = arith.constant 0 : i32
    return %c0_i32, %c0_i32_0 : i32, i32
  }
  func.func @transform_12(%arg0: i32) -> (i32, i32) {
    %c0_i32 = arith.constant 0 : i32
    %c0_i32_0 = arith.constant 0 : i32
    %c0_i32_1 = arith.constant 0 : i32
    return %c0_i32, %c0_i32_0 : i32, i32
  }
  func.func @transform_13(%arg0: i32) -> (i32, i32) {
    %c0_i32 = arith.constant 0 : i32
    %c0_i32_0 = arith.constant 0 : i32
    %c0_i32_1 = arith.constant 0 : i32
    return %c0_i32, %c0_i32_0 : i32, i32
  }
  func.func @transform_14(%arg0: i32) -> (i32, i32) {
    %c0_i32 = arith.constant 0 : i32
    %c0_i32_0 = arith.constant 0 : i32
    %c0_i32_1 = arith.constant 0 : i32
    return %c0_i32, %c0_i32_0 : i32, i32
  }
  func.func @transform_15(%arg0: i32) -> (i32, i32) {
    %c0_i32 = arith.constant 0 : i32
    %c0_i32_0 = arith.constant 0 : i32
    %c0_i32_1 = arith.constant 0 : i32
    return %c0_i32, %c0_i32_0 : i32, i32
  }
  func.func @transform_16(%arg0: i32) -> (i32, i32) {
    %c0_i32 = arith.constant 0 : i32
    %c0_i32_0 = arith.constant 0 : i32
    %c0_i32_1 = arith.constant 0 : i32
    return %c0_i32, %c0_i32_0 : i32, i32
  }
}

</mosaic_0001>

<bundles_post_ra>
// kernel: baseline_rnn_forward.1
= control target key start
LH: loop header
LB: loop body
LE: loop exit
PB: predicated region body
PF: predicated region fallthrough
CT: control target
= control target key end

     0   :  { %s5359_s0 = inlined_call_operand.vmem [shape: bf16[8,6144], index: 0, kind: input, shape index: {}]   ;;  %s5360_s1 = inlined_call_operand.vmem [shape: bf16[8,768], index: 1, kind: input, shape index: {}]   ;;  %s5361_s2 = inlined_call_operand.vmem [shape: bf16[6144,128], index: 2, kind: input, shape index: {}]   ;;  %s5362_s3 = inlined_call_operand.vmem [shape: f32[1,128], index: 3, kind: input, shape index: {}]   ;;  %s5363_s4 = inlined_call_operand.vmem [shape: bf16[768,128], index: 4, kind: input, shape index: {}]   ;;  %s5364_s5 = inlined_call_operand.vmem [shape: f32[1,128], index: 5, kind: input, shape index: {}]   ;;  %s5365_s6 = inlined_call_operand.vmem [shape: bf16[128,384], index: 6, kind: input, shape index: {}]   ;;  %s5366_s7 = inlined_call_operand.vmem [shape: f32[1,384], index: 7, kind: input, shape index: {}]   ;;  %s5367_s8 = inlined_call_operand.vmem [shape: bf16[128,128], index: 8, kind: input, shape index: {}]   ;;  %s5368_s9 = inlined_call_operand.vmem [shape: f32[1,128], index: 9, kind: input, shape index: {}]   ;;  %s5369_s10 = inlined_call_operand.vmem [shape: bf16[2,128,128], index: 10, kind: input, shape index: {}]   ;;  %s5370_s11 = inlined_call_operand.vmem [shape: f32[1,128], index: 11, kind: input, shape index: {}]   ;;  %s5371_s12 = inlined_call_operand.vmem [shape: bf16[128,64], index: 12, kind: input, shape index: {}]   ;;  %s5372_s13 = inlined_call_operand.vmem [shape: f32[1,64], index: 13, kind: input, shape index: {}]   ;;  %s5373_s14 = inlined_call_operand.vmem [shape: bf16[64,128], index: 14, kind: input, shape index: {}]   ;;  %s5374_s15 = inlined_call_operand.vmem [shape: f32[1,128], index: 15, kind: input, shape index: {}]   ;;  %s5375_s16 = inlined_call_operand.hbm [shape: f32[8,128], index: 16, kind: output, shape index: {}]  }
   0x1   :  { %5376 = sst [smem:[#allocation6_spill]] %s5359_s0 }
   0x2   :  { %21 = vsyncpa [#allocation4], 0  ;;  %s4730_s21 = smov 0  }
   0x3 LB: > { %s4736_s22 = sadd.s32 4294967295, %s4637_s21   ;;  %p3575_p0 = scmp.ge.s32.totalorder %s4637_s21, 1  ;;  %s4637_s21 = sphi %s4730_s21, %s27_s21  }
   0x4   : > { %p470_p1 = scmp.lt.s32.totalorder %s4637_s21, 4 }
   0x6   : > { %p471_p2 = pnand %p3575_p0, %p470_p1 }
   0x7   : > { %s3576_s23 = sshll.u32 (!%p471_p2), %s4736_s22, 4  ;;  %s3578_s24 = sshll.u32 (!%p471_p2), %s4736_s22, 8 }
   0x8   : > { %474 = sbr.rel (%p471_p2) target bundleno = 3113 (0xc29), region = 84  ;;  %p521_p3 = scmp.lt.s32.totalorder (!%p471_p2), %s3576_s23, 47 }
   0x9   : > { %p527_p4 = scmp.lt.s32.totalorder (!%p471_p2), %s3578_s24, 767  ;;  %s5377_s28 = sld [smem:[#allocation6_spill]] (!%p471_p2) }
   0xa   : > { %p3580_p5 = scmp.ne.s32.totalorder (!%p471_p2), %s4736_s22, 0 }
   0xf   : > { %s5379_s23 = smov (!%p521_p3, %s3576_s23), 47  ;;  %s5381_s24 = smov (!%p527_p4, %s3578_s24), 767 }
  0x10   : > { %s3577_s25 = sshll.u32 %s5379_s23, 2  ;;  %s3579_s30 = sshll.u32 %s5381_s24, 2  ;;  %v4639_v0 = vmov (!%p3580_p5), 0.0  }
  0x11   : > { %s4745_s29 = scalar_lea.vmem %s5377_s28, %s3577_s25  ;;  %s4750_s18 = scalar_lea.vmem %s5361_s2, %s3579_s30  ;;  %537 = vst [vmem:[#allocation2] sm:$0xff] (!%p3580_p5), %v4639_v0 }
  0x12   : > { %536 = sbr.rel (%p3580_p5) target bundleno = 25 (0x19), region = 88 }
  0x19 PF: > { %v4327_v1 = vld [vmem:[%s4750_s18 + $0x40] sm:$0xff]   ;;  %v4331_v5 = vld [vmem:[%s4750_s18 + $0x48] sm:$0xff]   ;;  %v4335_v9 = vld [vmem:[%s4750_s18 + $0x50] sm:$0xff]   ;;  %p3725_p6 = scmp.ne.s32.totalorder %s4736_s22, 2 }
  0x1a   : > { %v4328_v2 = vld [vmem:[%s4750_s18 + $0xc0] sm:$0xff]   ;;  %3871 = vmatprep.subr.bf16.mxu0 %v4327_v1  ;;  %v4332_v6 = vld [vmem:[%s4750_s18 + $0xc8] sm:$0xff]   ;;  %v4336_v10 = vld [vmem:[%s4750_s18 + $0xd0] sm:$0xff]   ;;  %vm4642_vm0 = vmmov (!%p3725_p6), 0   ;;  %vm2760_vm1 = vcmask (!%p3725_p6), 523264   ;;  %s4643_s17 = smov (!%p3725_p6), 64  }
  0x1b   : > { %v4329_v3 = vld [vmem:[%s4750_s18] sm:$0xff]   ;;  %3893 = vmatprep.subr.bf16.mxu1 %v4328_v2  ;;  %v4333_v7 = vld [vmem:[%s4750_s18 + $0x8] sm:$0xff]   ;;  %v4337_v11 = vld [vmem:[%s4750_s18 + $0x10] sm:$0xff]   ;;  %vm2823_vm2 = vcmask (!%p3725_p6), 1043456   ;;  %vm2807_vm3 = vcmask (!%p3725_p6), 64512  }
  0x1c   : > { %v4330_v4 = vld [vmem:[%s4750_s18 + $0x80] sm:$0xff]   ;;  %3872 = vmatpush3.bf16.msra.mxu0 %v4329_v3  ;;  %v4334_v8 = vld [vmem:[%s4750_s18 + $0x88] sm:$0xff]   ;;  %v4338_v12 = vld [vmem:[%s4750_s18 + $0x90] sm:$0xff]  }
  0x1d   : > { %3894 = vmatpush3.bf16.msra.mxu1 %v4330_v4  ;;  %3873 = vmatprep.subr.bf16.mxu0 %v4331_v5  ;;  %v4339_v13 = vld [vmem:[%s4750_s18 + $0x58] sm:$0xff]   ;;  %v4343_v17 = vld [vmem:[%s4750_s18 + $0x60] sm:$0xff]   ;;  %v4347_v21 = vld [vmem:[%s4750_s18 + $0x68] sm:$0xff]  }
  0x1e   : > { %3895 = vmatprep.subr.bf16.mxu1 %v4332_v6  ;;  %v4340_v14 = vld [vmem:[%s4750_s18 + $0xd8] sm:$0xff]   ;;  %v4344_v18 = vld [vmem:[%s4750_s18 + $0xe0] sm:$0xff]   ;;  %v4348_v22 = vld [vmem:[%s4750_s18 + $0xe8] sm:$0xff]  }
  0x1f   : > { %v4341_v15 = vld [vmem:[%s4750_s18 + $0x18] sm:$0xff]   ;;  %v4345_v19 = vld [vmem:[%s4750_s18 + $0x20] sm:$0xff]   ;;  %v4349_v23 = vld [vmem:[%s4750_s18 + $0x28] sm:$0xff]  }
  0x20   : > { %3874 = vmatpush3.bf16.msra.mxu0 %v4333_v7  ;;  %v4342_v16 = vld [vmem:[%s4750_s18 + $0x98] sm:$0xff]   ;;  %v4346_v20 = vld [vmem:[%s4750_s18 + $0xa0] sm:$0xff]   ;;  %v4350_v24 = vld [vmem:[%s4750_s18 + $0xa8] sm:$0xff]  }
  0x21   : > { %3896 = vmatpush3.bf16.msra.mxu1 %v4334_v8  ;;  %3875 = vmatprep.subr.bf16.mxu0 %v4335_v9  ;;  %v4351_v25 = vld [vmem:[%s4750_s18 + $0x70] sm:$0xff]   ;;  %v4355_v29 = vld [vmem:[%s4750_s18 + $0x78] sm:$0xff]   ;;  %v539_v33 = vld [vmem:[%s4745_s29] sm:$0xff] }
  0x22   : > { %3897 = vmatprep.subr.bf16.mxu1 %v4336_v10  ;;  %v4352_v26 = vld [vmem:[%s4750_s18 + $0xf0] sm:$0xff]   ;;  %v4356_v30 = vld [vmem:[%s4750_s18 + $0xf8] sm:$0xff]   ;;  %v540_v34 = vld [vmem:[%s4745_s29 + $0x8] sm:$0xff]  ;;  %v3581_v35 = vcombine.low %v539_v33, %v539_v33  ;;  %v3582_v36 = vcombine.high %v539_v33, %v539_v33 }
  0x23   : > { %v4353_v27 = vld [vmem:[%s4750_s18 + $0x30] sm:$0xff]   ;;  %v4357_v31 = vld [vmem:[%s4750_s18 + $0x38] sm:$0xff]   ;;  %v3583_v37 = vcombine.low %v540_v34, %v540_v34  ;;  %v3584_v38 = vcombine.high %v540_v34, %v540_v34  ;;  %v4363_v39 = vld [vmem:[%s4750_s18 + $0x140] sm:$0xff]  }
  0x24   : > { %3876 = vmatpush3.bf16.msra.mxu0 %v4337_v11  ;;  %v4354_v28 = vld [vmem:[%s4750_s18 + $0xb0] sm:$0xff]   ;;  %v4358_v32 = vld [vmem:[%s4750_s18 + $0xb8] sm:$0xff]   ;;  %v4364_v40 = vld [vmem:[%s4750_s18 + $0x1c0] sm:$0xff]   ;;  %1659 = vmatprep.mubr.bf16.mxu0 %v3582_v36 }
  0x25   : > { %3898 = vmatpush3.bf16.msra.mxu1 %v4338_v12  ;;  %3877 = vmatprep.subr.bf16.mxu0 %v4339_v13  ;;  %v4365_v41 = vld [vmem:[%s4750_s18 + $0x100] sm:$0xff]   ;;  %v4367_v43 = vld [vmem:[%s4750_s18 + $0x148] sm:$0xff]   ;;  %v4371_v47 = vld [vmem:[%s4750_s18 + $0x150] sm:$0xff]  }
  0x26   : > { %3899 = vmatprep.subr.bf16.mxu1 %v4340_v14  ;;  %1699 = vmatprep.mubr.bf16.mxu1 %v3584_v38  ;;  %v4366_v42 = vld [vmem:[%s4750_s18 + $0x180] sm:$0xff]   ;;  %v4368_v44 = vld [vmem:[%s4750_s18 + $0x1c8] sm:$0xff]   ;;  %v4372_v48 = vld [vmem:[%s4750_s18 + $0x1d0] sm:$0xff]  }
  0x27   : > { %v4369_v45 = vld [vmem:[%s4750_s18 + $0x108] sm:$0xff]   ;;  %v4373_v49 = vld [vmem:[%s4750_s18 + $0x110] sm:$0xff]   ;;  %v4375_v51 = vld [vmem:[%s4750_s18 + $0x158] sm:$0xff]  }
  0x28   : > { %3878 = vmatpush3.bf16.msra.mxu0 %v4341_v15  ;;  %v4370_v46 = vld [vmem:[%s4750_s18 + $0x188] sm:$0xff]   ;;  %v4374_v50 = vld [vmem:[%s4750_s18 + $0x190] sm:$0xff]   ;;  %v4376_v52 = vld [vmem:[%s4750_s18 + $0x1d8] sm:$0xff]  }
  0x29   : > { %3900 = vmatpush3.bf16.msra.mxu1 %v4342_v16  ;;  %3879 = vmatprep.subr.bf16.mxu0 %v4343_v17  ;;  %v4377_v53 = vld [vmem:[%s4750_s18 + $0x118] sm:$0xff]   ;;  %v4379_v55 = vld [vmem:[%s4750_s18 + $0x160] sm:$0xff]   ;;  %v4383_v59 = vld [vmem:[%s4750_s18 + $0x168] sm:$0xff]  }
  0x2a   : > { %3901 = vmatprep.subr.bf16.mxu1 %v4344_v18  ;;  %v4378_v54 = vld [vmem:[%s4750_s18 + $0x198] sm:$0xff]   ;;  %v4380_v56 = vld [vmem:[%s4750_s18 + $0x1e0] sm:$0xff]   ;;  %v4384_v60 = vld [vmem:[%s4750_s18 + $0x1e8] sm:$0xff]  }
  0x2b   : > { %v4381_v57 = vld [vmem:[%s4750_s18 + $0x120] sm:$0xff]   ;;  %v4385_v61 = vld [vmem:[%s4750_s18 + $0x128] sm:$0xff]   ;;  %v4387_v63 = vld [vmem:[%s4750_s18 + $0x170] sm:$0xff]  }
  0x2c   : > { %3880 = vmatpush3.bf16.msra.mxu0 %v4345_v19  ;;  %v4382_v58 = vld [vmem:[%s4750_s18 + $0x1a0] sm:$0xff]   ;;  %v4386_v62 = vld [vmem:[%s4750_s18 + $0x1a8] sm:$0xff]   ;;  %v4388_v0 = vld [vmem:[%s4750_s18 + $0x1f0] sm:$0xff]  }
  0x2d   : > { %3902 = vmatpush3.bf16.msra.mxu1 %v4346_v20  ;;  %3881 = vmatprep.subr.bf16.mxu0 %v4347_v21  ;;  %v4389_v1 = vld [vmem:[%s4750_s18 + $0x130] sm:$0xff]   ;;  %v4391_v3 = vld [vmem:[%s4750_s18 + $0x178] sm:$0xff]   ;;  %v4399_v13 = vld [vmem:[%s4750_s18 + $0x240] sm:$0xff]  }
  0x2e   : > { %3903 = vmatprep.subr.bf16.mxu1 %v4348_v22  ;;  %v4390_v2 = vld [vmem:[%s4750_s18 + $0x1b0] sm:$0xff]   ;;  %v4392_v4 = vld [vmem:[%s4750_s18 + $0x1f8] sm:$0xff]   ;;  %v4400_v14 = vld [vmem:[%s4750_s18 + $0x2c0] sm:$0xff]  }
  0x2f   : > { %v4393_v5 = vld [vmem:[%s4750_s18 + $0x138] sm:$0xff]   ;;  %v541_v7 = vld [vmem:[%s4745_s29 + $0x10] sm:$0xff]  ;;  %v4401_v15 = vld [vmem:[%s4750_s18 + $0x200] sm:$0xff]  }
  0x30   : > { %3882 = vmatpush3.bf16.msra.mxu0 %v4349_v23  ;;  %v4394_v6 = vld [vmem:[%s4750_s18 + $0x1b8] sm:$0xff]   ;;  %v3585_v8 = vcombine.low %v541_v7, %v541_v7  ;;  %v3586_v9 = vcombine.high %v541_v7, %v541_v7  ;;  %v4402_v16 = vld [vmem:[%s4750_s18 + $0x280] sm:$0xff]   ;;  %v4403_v17 = vld [vmem:[%s4750_s18 + $0x248] sm:$0xff]  }
  0x31   : > { %3904 = vmatpush3.bf16.msra.mxu1 %v4350_v24  ;;  %3883 = vmatprep.subr.bf16.mxu0 %v4351_v25  ;;  %v542_v10 = vld [vmem:[%s4745_s29 + $0x18] sm:$0xff]  ;;  %v4404_v18 = vld [vmem:[%s4750_s18 + $0x2c8] sm:$0xff]   ;;  %v4407_v21 = vld [vmem:[%s4750_s18 + $0x250] sm:$0xff]  }
  0x32   : > { %3905 = vmatprep.subr.bf16.mxu1 %v4352_v26  ;;  %v3587_v11 = vcombine.low %v542_v10, %v542_v10  ;;  %v3588_v12 = vcombine.high %v542_v10, %v542_v10  ;;  %v4405_v19 = vld [vmem:[%s4750_s18 + $0x208] sm:$0xff]   ;;  %v4408_v22 = vld [vmem:[%s4750_s18 + $0x2d0] sm:$0xff]   ;;  %v4411_v25 = vld [vmem:[%s4750_s18 + $0x258] sm:$0xff]  }
  0x33   : > { %v4406_v20 = vld [vmem:[%s4750_s18 + $0x288] sm:$0xff]   ;;  %v4409_v23 = vld [vmem:[%s4750_s18 + $0x210] sm:$0xff]   ;;  %v4412_v26 = vld [vmem:[%s4750_s18 + $0x2d8] sm:$0xff]  }
  0x34   : > { %3884 = vmatpush3.bf16.msra.mxu0 %v4353_v27  ;;  %v4410_v24 = vld [vmem:[%s4750_s18 + $0x290] sm:$0xff]   ;;  %v4413_v27 = vld [vmem:[%s4750_s18 + $0x218] sm:$0xff]   ;;  %v4419_v33 = vld [vmem:[%s4750_s18 + $0x268] sm:$0xff]  }
  0x35   : > { %3906 = vmatpush3.bf16.msra.mxu1 %v4354_v28  ;;  %3885 = vmatprep.subr.bf16.mxu0 %v4355_v29  ;;  %v4414_v28 = vld [vmem:[%s4750_s18 + $0x298] sm:$0xff]   ;;  %v4415_v29 = vld [vmem:[%s4750_s18 + $0x260] sm:$0xff]   ;;  %v4420_v34 = vld [vmem:[%s4750_s18 + $0x2e8] sm:$0xff]  }
  0x36   : > { %3907 = vmatprep.subr.bf16.mxu1 %v4356_v30  ;;  %v4416_v30 = vld [vmem:[%s4750_s18 + $0x2e0] sm:$0xff]   ;;  %v4422_v36 = vld [vmem:[%s4750_s18 + $0x2a8] sm:$0xff]   ;;  %v4424_v38 = vld [vmem:[%s4750_s18 + $0x2f0] sm:$0xff]  }
  0x37   : > { %v4455_v7 = vld [vmem:[%s4750_s18 + $0x368] sm:$0xff]  }
  0x38   : > { %3886 = vmatpush3.bf16.msra.mxu0 %v4357_v31  ;;  %v4417_v31 = vld [vmem:[%s4750_s18 + $0x220] sm:$0xff]   ;;  %v4458_v10 = vld [vmem:[%s4750_s18 + $0x3a8] sm:$0xff]  }
  0x39   : > { %3908 = vmatpush3.bf16.msra.mxu1 %v4358_v32  ;;  %3915 = vmatprep.subr.bf16.mxu0 %v4363_v39  ;;  %v4418_v32 = vld [vmem:[%s4750_s18 + $0x2a0] sm:$0xff]   ;;  %v4425_v39 = vld [vmem:[%s4750_s18 + $0x230] sm:$0xff]  }
  0x3a   : > { %3937 = vmatprep.subr.bf16.mxu1 %v4364_v40  ;;  %v4426_v40 = vld [vmem:[%s4750_s18 + $0x2b0] sm:$0xff]  }
  0x3b   : > { %1660 = vmatmul.mubr.bf16.vlgmr.msra.gmra.mrb[0].mxu0 %v3581_v35  ;;  %v4421_v35 = vld [vmem:[%s4750_s18 + $0x228] sm:$0xff]  }
  0x3c   : > { %1700 = vmatmul.mubr.bf16.vlgmr.msra.gmra.mrb[0].mxu1 %v3583_v37  ;;  %3916 = vmatpush3.bf16.msra.mxu0 %v4365_v41  ;;  %v4423_v37 = vld [vmem:[%s4750_s18 + $0x270] sm:$0xff]   ;;  %v4427_v41 = vld [vmem:[%s4750_s18 + $0x278] sm:$0xff]  }
  0x3d   : > { %3938 = vmatpush3.bf16.msra.mxu1 %v4366_v42  ;;  %3917 = vmatprep.subr.bf16.mxu0 %v4367_v43  ;;  %v4428_v42 = vld [vmem:[%s4750_s18 + $0x2f8] sm:$0xff]  }
  0x3e   : > { %3939 = vmatprep.subr.bf16.mxu1 %v4368_v44  ;;  %1739 = vmatprep.mubr.bf16.mxu0 %v3586_v9  ;;  %v4429_v43 = vld [vmem:[%s4750_s18 + $0x238] sm:$0xff]   ;;  %v4457_v9 = vld [vmem:[%s4750_s18 + $0x328] sm:$0xff]  }
  0x3f   : > { %1779 = vmatprep.mubr.bf16.mxu1 %v3588_v12  ;;  %v4430_v44 = vld [vmem:[%s4750_s18 + $0x2b8] sm:$0xff]   ;;  %v4460_v12 = vld [vmem:[%s4750_s18 + $0x3f0] sm:$0xff]  }
  0x40   : > { %3918 = vmatpush3.bf16.msra.mxu0 %v4369_v45  ;;  %v543_v45 = vld [vmem:[%s4745_s29 + $0x20] sm:$0xff] }
  0x41   : > { %3940 = vmatpush3.bf16.msra.mxu1 %v4370_v46  ;;  %3919 = vmatprep.subr.bf16.mxu0 %v4371_v47  ;;  %v544_v46 = vld [vmem:[%s4745_s29 + $0x28] sm:$0xff]  ;;  %v3589_v47 = vcombine.low %v543_v45, %v543_v45 }
  0x42   : > { %3941 = vmatprep.subr.bf16.mxu1 %v4372_v48  ;;  %v3590_v48 = vcombine.high %v543_v45, %v543_v45 }
  0x44   : > { %3920 = vmatpush3.bf16.msra.mxu0 %v4373_v49  ;;  %v3591_v49 = vcombine.low %v544_v46, %v544_v46 }
  0x45   : > { %3942 = vmatpush3.bf16.msra.mxu1 %v4374_v50  ;;  %3921 = vmatprep.subr.bf16.mxu0 %v4375_v51  ;;  %v3592_v50 = vcombine.high %v544_v46, %v544_v46  ;;  %v4435_v51 = vld [vmem:[%s4750_s18 + $0x340] sm:$0xff]  }
  0x46   : > { %3943 = vmatprep.subr.bf16.mxu1 %v4376_v52  ;;  %v4436_v52 = vld [vmem:[%s4750_s18 + $0x3c0] sm:$0xff]  }
  0x48   : > { %3922 = vmatpush3.bf16.msra.mxu0 %v4377_v53  ;;  %v4437_v53 = vld [vmem:[%s4750_s18 + $0x300] sm:$0xff]  }
  0x49   : > { %3944 = vmatpush3.bf16.msra.mxu1 %v4378_v54  ;;  %3923 = vmatprep.subr.bf16.mxu0 %v4379_v55  ;;  %v4438_v54 = vld [vmem:[%s4750_s18 + $0x380] sm:$0xff]   ;;  %v4439_v55 = vld [vmem:[%s4750_s18 + $0x348] sm:$0xff]  }
  0x4a   : > { %3945 = vmatprep.subr.bf16.mxu1 %v4380_v56  ;;  %v4440_v56 = vld [vmem:[%s4750_s18 + $0x3c8] sm:$0xff]  }
  0x4c   : > { %3924 = vmatpush3.bf16.msra.mxu0 %v4381_v57  ;;  %v4441_v57 = vld [vmem:[%s4750_s18 + $0x308] sm:$0xff]  }
  0x4d   : > { %3946 = vmatpush3.bf16.msra.mxu1 %v4382_v58  ;;  %3925 = vmatprep.subr.bf16.mxu0 %v4383_v59  ;;  %v4442_v58 = vld [vmem:[%s4750_s18 + $0x388] sm:$0xff]   ;;  %v4443_v59 = vld [vmem:[%s4750_s18 + $0x350] sm:$0xff]  }
  0x4e   : > { %3947 = vmatprep.subr.bf16.mxu1 %v4384_v60  ;;  %v4444_v60 = vld [vmem:[%s4750_s18 + $0x3d0] sm:$0xff]  }
  0x50   : > { %3926 = vmatpush3.bf16.msra.mxu0 %v4385_v61  ;;  %v4445_v61 = vld [vmem:[%s4750_s18 + $0x310] sm:$0xff]  }
  0x51   : > { %3948 = vmatpush3.bf16.msra.mxu1 %v4386_v62  ;;  %3927 = vmatprep.subr.bf16.mxu0 %v4387_v63  ;;  %v4446_v62 = vld [vmem:[%s4750_s18 + $0x390] sm:$0xff]   ;;  %v4447_v63 = vld [vmem:[%s4750_s18 + $0x358] sm:$0xff]  }
  0x52   : > { %3949 = vmatprep.subr.bf16.mxu1 %v4388_v0  ;;  %v4448_v0 = vld [vmem:[%s4750_s18 + $0x3d8] sm:$0xff]  }
  0x54   : > { %3928 = vmatpush3.bf16.msra.mxu0 %v4389_v1  ;;  %v4449_v1 = vld [vmem:[%s4750_s18 + $0x318] sm:$0xff]  }
  0x55   : > { %3950 = vmatpush3.bf16.msra.mxu1 %v4390_v2  ;;  %3929 = vmatprep.subr.bf16.mxu0 %v4391_v3  ;;  %v4450_v2 = vld [vmem:[%s4750_s18 + $0x398] sm:$0xff]   ;;  %v4451_v3 = vld [vmem:[%s4750_s18 + $0x360] sm:$0xff]  }
  0x56   : > { %3951 = vmatprep.subr.bf16.mxu1 %v4392_v4  ;;  %v4452_v4 = vld [vmem:[%s4750_s18 + $0x3e0] sm:$0xff]  }
  0x58   : > { %3930 = vmatpush3.bf16.msra.mxu0 %v4393_v5  ;;  %v4453_v5 = vld [vmem:[%s4750_s18 + $0x320] sm:$0xff]  }
  0x59   : > { %3952 = vmatpush3.bf16.msra.mxu1 %v4394_v6  ;;  %3959 = vmatprep.subr.bf16.mxu0 %v4399_v13  ;;  %v4454_v6 = vld [vmem:[%s4750_s18 + $0x3a0] sm:$0xff]   ;;  %v4461_v13 = vld [vmem:[%s4750_s18 + $0x330] sm:$0xff]  }
  0x5a   : > { %3981 = vmatprep.subr.bf16.mxu1 %v4400_v14  ;;  %v4462_v14 = vld [vmem:[%s4750_s18 + $0x3b0] sm:$0xff]  }
  0x5b   : > { %1740 = vmatmul.mubr.bf16.vlgmr.msra.gmra.mrb[4].mxu0 %v3585_v8  ;;  %v4456_v8 = vld [vmem:[%s4750_s18 + $0x3e8] sm:$0xff]  }
  0x5c   : > { %1780 = vmatmul.mubr.bf16.vlgmr.msra.gmra.mrb[4].mxu1 %v3587_v11  ;;  %3960 = vmatpush3.bf16.msra.mxu0 %v4401_v15  ;;  %v4459_v11 = vld [vmem:[%s4750_s18 + $0x370] sm:$0xff]   ;;  %v4463_v15 = vld [vmem:[%s4750_s18 + $0x378] sm:$0xff]  }
  0x5d   : > { %3982 = vmatpush3.bf16.msra.mxu1 %v4402_v16  ;;  %3961 = vmatprep.subr.bf16.mxu0 %v4403_v17  ;;  %v4464_v16 = vld [vmem:[%s4750_s18 + $0x3f8] sm:$0xff]  }
  0x5e   : > { %3983 = vmatprep.subr.bf16.mxu1 %v4404_v18  ;;  %1819 = vmatprep.mubr.bf16.mxu0 %v3590_v48  ;;  %v4465_v17 = vld [vmem:[%s4750_s18 + $0x338] sm:$0xff]  }
  0x5f   : > { %1859 = vmatprep.mubr.bf16.mxu1 %v3592_v50  ;;  %v4466_v18 = vld [vmem:[%s4750_s18 + $0x3b8] sm:$0xff]  }
  0x60   : > { %3962 = vmatpush3.bf16.msra.mxu0 %v4405_v19  ;;  %v545_v19 = vld [vmem:[%s4745_s29 + $0x30] sm:$0xff] }
  0x61   : > { %3984 = vmatpush3.bf16.msra.mxu1 %v4406_v20  ;;  %3963 = vmatprep.subr.bf16.mxu0 %v4407_v21  ;;  %v546_v20 = vld [vmem:[%s4745_s29 + $0x38] sm:$0xff]  ;;  %v3593_v21 = vcombine.low %v545_v19, %v545_v19 }
  0x62   : > { %3985 = vmatprep.subr.bf16.mxu1 %v4408_v22  ;;  %v3594_v22 = vcombine.high %v545_v19, %v545_v19  ;;  %v4480_v19 = vld [vmem:[%s5363_s4 + $0x10] sm:$0xff] (!%p3725_p6)  }
  0x64   : > { %3964 = vmatpush3.bf16.msra.mxu0 %v4409_v23  ;;  %v3595_v23 = vcombine.low %v546_v20, %v546_v20 }
  0x65   : > { %3986 = vmatpush3.bf16.msra.mxu1 %v4410_v24  ;;  %3965 = vmatprep.subr.bf16.mxu0 %v4411_v25  ;;  %v3596_v24 = vcombine.high %v546_v20, %v546_v20  ;;  %v4481_v20 = vld [vmem:[%s5363_s4 + $0xd0] sm:$0xff] (!%p3725_p6)  }
  0x66   : > { %3987 = vmatprep.subr.bf16.mxu1 %v4412_v26 }
  0x68   : > { %3966 = vmatpush3.bf16.msra.mxu0 %v4413_v27 }
  0x69   : > { %3988 = vmatpush3.bf16.msra.mxu1 %v4414_v28  ;;  %3967 = vmatprep.subr.bf16.mxu0 %v4415_v29 }
  0x6a   : > { %3989 = vmatprep.subr.bf16.mxu1 %v4416_v30 }
  0x6c   : > { %3968 = vmatpush3.bf16.msra.mxu0 %v4417_v31 }
  0x6d   : > { %3990 = vmatpush3.bf16.msra.mxu1 %v4418_v32  ;;  %3969 = vmatprep.subr.bf16.mxu0 %v4419_v33 }
  0x6e   : > { %3991 = vmatprep.subr.bf16.mxu1 %v4420_v34 }
  0x70   : > { %3970 = vmatpush3.bf16.msra.mxu0 %v4421_v35 }
  0x71   : > { %3992 = vmatpush3.bf16.msra.mxu1 %v4422_v36  ;;  %3971 = vmatprep.subr.bf16.mxu0 %v4423_v37 }
  0x72   : > { %3993 = vmatprep.subr.bf16.mxu1 %v4424_v38 }
  0x74   : > { %3972 = vmatpush3.bf16.msra.mxu0 %v4425_v39 }
  0x75   : > { %3994 = vmatpush3.bf16.msra.mxu1 %v4426_v40  ;;  %3973 = vmatprep.subr.bf16.mxu0 %v4427_v41 }
  0x76   : > { %3995 = vmatprep.subr.bf16.mxu1 %v4428_v42 }
  0x78   : > { %3974 = vmatpush3.bf16.msra.mxu0 %v4429_v43 }
  0x79   : > { %3996 = vmatpush3.bf16.msra.mxu1 %v4430_v44  ;;  %4003 = vmatprep.subr.bf16.mxu0 %v4435_v51 }
  0x7a   : > { %4025 = vmatprep.subr.bf16.mxu1 %v4436_v52 }
  0x7b   : > { %1820 = vmatmul.mubr.bf16.vlgmr.msra.gmra.mrb[8].mxu0 %v3589_v47 }
  0x7c   : > { %1860 = vmatmul.mubr.bf16.vlgmr.msra.gmra.mrb[8].mxu1 %v3591_v49  ;;  %4004 = vmatpush3.bf16.msra.mxu0 %v4437_v53 }
  0x7d   : > { %4026 = vmatpush3.bf16.msra.mxu1 %v4438_v54  ;;  %4005 = vmatprep.subr.bf16.mxu0 %v4439_v55 }
  0x7e   : > { %4027 = vmatprep.subr.bf16.mxu1 %v4440_v56  ;;  %1899 = vmatprep.mubr.bf16.mxu0 %v3594_v22  ;;  %v4483_v22 = vld [vmem:[%s5363_s4 + $0x58] sm:$0xff] (!%p3725_p6)  }
  0x7f   : > { %1939 = vmatprep.mubr.bf16.mxu1 %v3596_v24  ;;  %v4485_v24 = vld [vmem:[%s5363_s4 + $0xd8] sm:$0xff] (!%p3725_p6)  }
  0x80   : > { %4006 = vmatpush3.bf16.msra.mxu0 %v4441_v57 }
  0x81   : > { %4028 = vmatpush3.bf16.msra.mxu1 %v4442_v58  ;;  %4007 = vmatprep.subr.bf16.mxu0 %v4443_v59 }
  0x82   : > { %4029 = vmatprep.subr.bf16.mxu1 %v4444_v60 }
  0x84   : > { %4008 = vmatpush3.bf16.msra.mxu0 %v4445_v61 }
  0x85   : > { %4030 = vmatpush3.bf16.msra.mxu1 %v4446_v62  ;;  %4009 = vmatprep.subr.bf16.mxu0 %v4447_v63 }
  0x86   : > { %4031 = vmatprep.subr.bf16.mxu1 %v4448_v0 }
  0x88   : > { %4010 = vmatpush3.bf16.msra.mxu0 %v4449_v1 }
  0x89   : > { %4032 = vmatpush3.bf16.msra.mxu1 %v4450_v2  ;;  %4011 = vmatprep.subr.bf16.mxu0 %v4451_v3 }
  0x8a   : > { %4033 = vmatprep.subr.bf16.mxu1 %v4452_v4 }
  0x8c   : > { %4012 = vmatpush3.bf16.msra.mxu0 %v4453_v5 }
  0x8d   : > { %4034 = vmatpush3.bf16.msra.mxu1 %v4454_v6  ;;  %4013 = vmatprep.subr.bf16.mxu0 %v4455_v7  ;;  %v538_v7 = vld [vmem:[#allocation2] sm:$0xff] }
  0x8e   : > { %4035 = vmatprep.subr.bf16.mxu1 %v4456_v8 }
  0x90   : > { %4014 = vmatpush3.bf16.msra.mxu0 %v4457_v9 }
  0x91   : > { %4036 = vmatpush3.bf16.msra.mxu1 %v4458_v10  ;;  %4015 = vmatprep.subr.bf16.mxu0 %v4459_v11  ;;  %v4471_v10 = vld [vmem:[%s5363_s4 + $0x40] sm:$0xff] (!%p3725_p6)  }
  0x92   : > { %4037 = vmatprep.subr.bf16.mxu1 %v4460_v12  ;;  %v4472_v11 = vld [vmem:[%s5363_s4] sm:$0xff] (!%p3725_p6)  }
  0x93   : > { %v4473_v12 = vld [vmem:[%s5363_s4 + $0xc0] sm:$0xff] (!%p3725_p6)  }
  0x94   : > { %4016 = vmatpush3.bf16.msra.mxu0 %v4461_v13  ;;  %v4474_v13 = vld [vmem:[%s5363_s4 + $0x80] sm:$0xff] (!%p3725_p6)  }
  0x95   : > { %4038 = vmatpush3.bf16.msra.mxu1 %v4462_v14  ;;  %4017 = vmatprep.subr.bf16.mxu0 %v4463_v15  ;;  %v4475_v14 = vld [vmem:[%s5363_s4 + $0x48] sm:$0xff] (!%p3725_p6)  }
  0x96   : > { %4039 = vmatprep.subr.bf16.mxu1 %v4464_v16  ;;  %v4476_v15 = vld [vmem:[%s5363_s4 + $0x8] sm:$0xff] (!%p3725_p6)  }
  0x97   : > { %v4477_v16 = vld [vmem:[%s5363_s4 + $0xc8] sm:$0xff] (!%p3725_p6)  }
  0x98   : > { %4018 = vmatpush3.bf16.msra.mxu0 %v4465_v17  ;;  %v4478_v17 = vld [vmem:[%s5363_s4 + $0x88] sm:$0xff] (!%p3725_p6)  }
  0x99   : > { %4040 = vmatpush3.bf16.msra.mxu1 %v4466_v18  ;;  %4047 = vmatprep.subr.bf16.mxu0 (!%p3725_p6), %v4471_v10  ;;  %v4479_v18 = vld [vmem:[%s5363_s4 + $0x50] sm:$0xff] (!%p3725_p6)  }
  0x9a   : > { %4069 = vmatprep.subr.bf16.mxu1 (!%p3725_p6), %v4473_v12  ;;  %v4535_v10 = vld [vmem:[%s5365_s6 + $0x34] ss:$12 sps:$4 sm:$0xff] (!%p3725_p6)   ;;  %v4536_v12 = vld [vmem:[%s5365_s6 + $0x38] ss:$12 sps:$4 sm:$0xff] (!%p3725_p6)  }
  0x9b   : > { %1900 = vmatmul.mubr.bf16.vlgmr.msra.gmra.mrb[12].mxu0 %v3593_v21  ;;  %v4482_v21 = vld [vmem:[%s5363_s4 + $0x90] sm:$0xff] (!%p3725_p6)  }
  0x9c   : > { %1940 = vmatmul.mubr.bf16.vlgmr.msra.gmra.mrb[12].mxu1 %v3595_v23  ;;  %4048 = vmatpush3.bf16.msra.mxu0 (!%p3725_p6), %v4472_v11  ;;  %v4484_v23 = vld [vmem:[%s5363_s4 + $0x18] sm:$0xff] (!%p3725_p6)  }
  0x9d   : > { %4070 = vmatpush3.bf16.msra.mxu1 (!%p3725_p6), %v4474_v13  ;;  %4049 = vmatprep.subr.bf16.mxu0 (!%p3725_p6), %v4475_v14  ;;  %v4533_v11 = vld [vmem:[%s5365_s6 + $0x30] ss:$12 sps:$4 sm:$0xff] (!%p3725_p6)   ;;  %v4539_v13 = vld [vmem:[%s5365_s6 + $0x4c] ss:$12 sps:$4 sm:$0xff] (!%p3725_p6)   ;;  %v4537_v14 = vld [vmem:[%s5365_s6 + $0x48] ss:$12 sps:$4 sm:$0xff] (!%p3725_p6)  }
  0x9e   : > { %4071 = vmatprep.subr.bf16.mxu1 (!%p3725_p6), %v4477_v16  ;;  %v4543_v16 = vld [vmem:[%s5365_s6 + $0x64] ss:$12 sps:$4 sm:$0xff] (!%p3725_p6)  }
  0xa0   : > { %4050 = vmatpush3.bf16.msra.mxu0 (!%p3725_p6), %v4476_v15  ;;  %v4540_v15 = vld [vmem:[%s5365_s6 + $0x50] ss:$12 sps:$4 sm:$0xff] (!%p3725_p6)  }
  0xa1   : > { %4072 = vmatpush3.bf16.msra.mxu1 (!%p3725_p6), %v4478_v17  ;;  %4051 = vmatprep.subr.bf16.mxu0 (!%p3725_p6), %v4479_v18  ;;  %v4541_v17 = vld [vmem:[%s5365_s6 + $0x60] ss:$12 sps:$4 sm:$0xff] (!%p3725_p6)   ;;  %v4544_v18 = vld [vmem:[%s5365_s6 + $0x68] ss:$12 sps:$4 sm:$0xff] (!%p3725_p6)  }
  0xa2   : > { %4073 = vmatprep.subr.bf16.mxu1 (!%p3725_p6), %v4481_v20  ;;  %v4545_v20 = vld [vmem:[%s5365_s6 + $0x78] ss:$12 sps:$4 sm:$0xff] (!%p3725_p6)  }
  0xa4   : > { %4052 = vmatpush3.bf16.msra.mxu0 (!%p3725_p6), %v4480_v19  ;;  %v4547_v19 = vld [vmem:[%s5365_s6 + $0x7c] ss:$12 sps:$4 sm:$0xff] (!%p3725_p6)  }
  0xa5   : > { %4074 = vmatpush3.bf16.msra.mxu1 (!%p3725_p6), %v4482_v21  ;;  %4053 = vmatprep.subr.bf16.mxu0 (!%p3725_p6), %v4483_v22  ;;  %v4548_v21 = vld [vmem:[%s5365_s6 + $0x80] ss:$12 sps:$4 sm:$0xff] (!%p3725_p6)  }
  0xa6   : > { %4075 = vmatprep.subr.bf16.mxu1 (!%p3725_p6), %v4485_v24  ;;  %v4551_v22 = vld [vmem:[%s5365_s6 + $0x94] ss:$12 sps:$4 sm:$0xff] (!%p3725_p6)   ;;  %v4552_v24 = vld [vmem:[%s5365_s6 + $0x98] ss:$12 sps:$4 sm:$0xff] (!%p3725_p6)  }
  0xa8   : > { %4054 = vmatpush3.bf16.msra.mxu0 (!%p3725_p6), %v4484_v23  ;;  %v4549_v23 = vld [vmem:[%s5365_s6 + $0x90] ss:$12 sps:$4 sm:$0xff] (!%p3725_p6)  }
 0x10e   : > { %v3887_v25 = vpop.f32.mrb[0].mxu0 }
 0x10f   : > { %v3909_v26 = vpop.f32.mrb[0].mxu1  ;;  %v3888_v27 = vpop.f32.mrb[1].mxu0 }
 0x110   : > { %v3910_v28 = vpop.f32.mrb[1].mxu1  ;;  %v3889_v29 = vadd.f32 %v3888_v27, %v3887_v25  ;;  %v3890_v31 = vpop.f32.mrb[2].mxu0  ;;  %v4486_v25 = vld [vmem:[%s5363_s4 + $0x98] sm:$0xff] (!%p3725_p6)   ;;  %v4488_v27 = vld [vmem:[%s5363_s4 + $0x20] sm:$0xff] (!%p3725_p6)  }
 0x111   : > { %v3911_v30 = vadd.f32 %v3910_v28, %v3909_v26  ;;  %v3912_v32 = vpop.f32.mrb[2].mxu1  ;;  %v3891_v33 = vpop.f32.mrb[3].mxu0  ;;  %v4487_v26 = vld [vmem:[%s5363_s4 + $0x60] sm:$0xff] (!%p3725_p6)   ;;  %4076 = vmatpush3.bf16.msra.mxu1 (!%p3725_p6), %v4486_v25  ;;  %v4492_v31 = vld [vmem:[%s5363_s4 + $0x28] sm:$0xff] (!%p3725_p6)  }
 0x112   : > { %v3913_v34 = vpop.f32.mrb[3].mxu1  ;;  %4055 = vmatprep.subr.bf16.mxu0 (!%p3725_p6), %v4487_v26  ;;  %v4489_v28 = vld [vmem:[%s5363_s4 + $0xe0] sm:$0xff] (!%p3725_p6)   ;;  %v4493_v32 = vld [vmem:[%s5363_s4 + $0xe8] sm:$0xff] (!%p3725_p6)  }
 0x113   : > { %v1702_v35 = vadd.f32 %v3911_v30, %v3889_v29  ;;  %4056 = vmatpush3.bf16.msra.mxu0 (!%p3725_p6), %v4488_v27  ;;  %v4490_v29 = vld [vmem:[%s5363_s4 + $0xa0] sm:$0xff] (!%p3725_p6)   ;;  %4077 = vmatprep.subr.bf16.mxu1 (!%p3725_p6), %v4489_v28  ;;  %v4491_v30 = vld [vmem:[%s5363_s4 + $0x68] sm:$0xff] (!%p3725_p6)   ;;  %v4495_v34 = vld [vmem:[%s5363_s4 + $0x70] sm:$0xff] (!%p3725_p6)   ;;  %v4641_v28 = vmov (!%p3725_p6), 0  }
 0x114   : > { %4057 = vmatprep.subr.bf16.mxu0 (!%p3725_p6), %v4491_v30  ;;  %v4494_v33 = vld [vmem:[%s5363_s4 + $0xa8] sm:$0xff] (!%p3725_p6)   ;;  %v4556_v27 = vld [vmem:[%s5365_s6 + $0xb0] ss:$12 sps:$4 sm:$0xff] (!%p3725_p6)   ;;  %v3727_v30 = vld [vmem:[%s5364_s5] ss:$0 sm:$0xff] (!%p3725_p6) }
 0x115   : > { %4078 = vmatpush3.bf16.msra.mxu1 (!%p3725_p6), %v4490_v29  ;;  %v4555_v25 = vld [vmem:[%s5365_s6 + $0xac] ss:$12 sps:$4 sm:$0xff] (!%p3725_p6)   ;;  %v4553_v26 = vld [vmem:[%s5365_s6 + $0xa8] ss:$12 sps:$4 sm:$0xff] (!%p3725_p6)  }
 0x116   : > { %4079 = vmatprep.subr.bf16.mxu1 (!%p3725_p6), %v4493_v32 }
 0x117   : > { %4058 = vmatpush3.bf16.msra.mxu0 (!%p3725_p6), %v4492_v31 }
 0x118   : > { %4059 = vmatprep.subr.bf16.mxu0 (!%p3725_p6), %v4495_v34 }
 0x119   : > { %4080 = vmatpush3.bf16.msra.mxu1 (!%p3725_p6), %v4494_v33 }
 0x12e   : > { %v3931_v36 = vpop.f32.mrb[4].mxu0 }
 0x12f   : > { %v3953_v37 = vpop.f32.mrb[4].mxu1  ;;  %v3932_v38 = vpop.f32.mrb[5].mxu0 }
 0x130   : > { %v3954_v39 = vpop.f32.mrb[5].mxu1  ;;  %v3933_v40 = vadd.f32 %v3932_v38, %v3931_v36  ;;  %v3934_v42 = vpop.f32.mrb[6].mxu0  ;;  %v4497_v36 = vld [vmem:[%s5363_s4 + $0xf0] sm:$0xff] (!%p3725_p6)   ;;  %v4499_v38 = vld [vmem:[%s5363_s4 + $0x78] sm:$0xff] (!%p3725_p6)  }
 0x131   : > { %v3955_v41 = vadd.f32 %v3954_v39, %v3953_v37  ;;  %v3956_v43 = vpop.f32.mrb[6].mxu1  ;;  %v3935_v44 = vpop.f32.mrb[7].mxu0  ;;  %v4498_v37 = vld [vmem:[%s5363_s4 + $0xb0] sm:$0xff] (!%p3725_p6)   ;;  %4081 = vmatprep.subr.bf16.mxu1 (!%p3725_p6), %v4497_v36  ;;  %v4500_v39 = vld [vmem:[%s5363_s4 + $0x38] sm:$0xff] (!%p3725_p6)  }
 0x132   : > { %v3957_v45 = vpop.f32.mrb[7].mxu1  ;;  %v1742_v46 = vadd.f32 %v3933_v40, %v1702_v35  ;;  %v4496_v35 = vld [vmem:[%s5363_s4 + $0x30] sm:$0xff] (!%p3725_p6)   ;;  %4082 = vmatpush3.bf16.msra.mxu1 (!%p3725_p6), %v4498_v37  ;;  %v4501_v40 = vld [vmem:[%s5363_s4 + $0xf8] sm:$0xff] (!%p3725_p6)  }
 0x133   : > { %4060 = vmatpush3.bf16.msra.mxu0 (!%p3725_p6), %v4496_v35  ;;  %4083 = vmatprep.subr.bf16.mxu1 (!%p3725_p6), %v4501_v40  ;;  %v4504_v44 = vld [vmem:[%s5363_s4 + $0xb8] sm:$0xff] (!%p3725_p6)   ;;  %v4505_v45 = vld [vmem:[%s5363_s4 + $0x140] sm:$0xff] (!%p3725_p6)  }
 0x134   : > { %v1782_v47 = vadd.f32 %v3955_v41, %v1742_v46  ;;  %4061 = vmatprep.subr.bf16.mxu0 (!%p3725_p6), %v4499_v38  ;;  %v1962_v41 = vld [vmem:[%s5360_s1] sm:$0xff] (!%p3725_p6)  ;;  %v1963_v46 = vld [vmem:[%s5360_s1 + $0x8] sm:$0xff] (!%p3725_p6) }
 0x135   : > { %v3728_v42 = vcombine.low (!%p3725_p6), %v1962_v41, %v1962_v41  ;;  %v3729_v43 = vcombine.high (!%p3725_p6), %v1962_v41, %v1962_v41 }
 0x136   : > { %4084 = vmatpush3.bf16.msra.mxu1 (!%p3725_p6), %v4504_v44 }
 0x137   : > { %4062 = vmatpush3.bf16.msra.mxu0 (!%p3725_p6), %v4500_v39  ;;  %2409 = vmatprep.mubr.bf16.mxu0 (!%p3725_p6), %v3729_v43 }
 0x138   : > { %4091 = vmatprep.subr.bf16.mxu0 (!%p3725_p6), %v4505_v45 }
 0x13a   : > { %2410 = vmatmul.mubr.bf16.vlgmr.msra.gmra.mrb[0].mxu0 (!%p3725_p6), %v3728_v42 }
 0x14e   : > { %v3975_v48 = vpop.f32.mrb[8].mxu0 }
 0x14f   : > { %v3997_v49 = vpop.f32.mrb[8].mxu1  ;;  %v3976_v50 = vpop.f32.mrb[9].mxu0 }
 0x150   : > { %v3977_v51 = vadd.f32 %v3976_v50, %v3975_v48  ;;  %v3998_v52 = vpop.f32.mrb[9].mxu1  ;;  %v3978_v53 = vpop.f32.mrb[10].mxu0  ;;  %v3731_v48 = vcombine.high (!%p3725_p6), %v1963_v46, %v1963_v46  ;;  %v4509_v50 = vld [vmem:[%s5363_s4 + $0x148] sm:$0xff] (!%p3725_p6)  }
 0x151   : > { %v3999_v54 = vadd.f32 %v3998_v52, %v3997_v49  ;;  %v4000_v55 = vpop.f32.mrb[10].mxu1  ;;  %v3979_v56 = vpop.f32.mrb[11].mxu0  ;;  %v4508_v49 = vld [vmem:[%s5363_s4 + $0x100] sm:$0xff] (!%p3725_p6)   ;;  %v4511_v52 = vld [vmem:[%s5363_s4 + $0x150] sm:$0xff] (!%p3725_p6)  }
 0x152   : > { %v1822_v57 = vadd.f32 %v3977_v51, %v1782_v47  ;;  %v4001_v58 = vpop.f32.mrb[11].mxu1  ;;  %v3730_v47 = vcombine.low (!%p3725_p6), %v1963_v46, %v1963_v46  ;;  %2449 = vmatprep.mubr.bf16.mxu1 (!%p3725_p6), %v3731_v48  ;;  %4092 = vmatpush3.bf16.msra.mxu0 (!%p3725_p6), %v4508_v49  ;;  %v4510_v51 = vld [vmem:[%s5363_s4 + $0x108] sm:$0xff] (!%p3725_p6)   ;;  %v4512_v53 = vld [vmem:[%s5363_s4 + $0x110] sm:$0xff] (!%p3725_p6)   ;;  %v4514_v55 = vld [vmem:[%s5363_s4 + $0x118] sm:$0xff] (!%p3725_p6)   ;;  %v2532_v49 = vlaneseq (!%p3725_p6) }
 0x153   : > { %4093 = vmatprep.subr.bf16.mxu0 (!%p3725_p6), %v4509_v50  ;;  %v4515_v56 = vld [vmem:[%s5363_s4 + $0x160] sm:$0xff] (!%p3725_p6)   ;;  %v4517_v58 = vld [vmem:[%s5363_s4 + $0x168] sm:$0xff] (!%p3725_p6)  }
 0x154   : > { %v1862_v59 = vadd.f32 %v3999_v54, %v1822_v57  ;;  %2450 = vmatmul.mubr.bf16.vlgmr.msra.gmra.mrb[0].mxu1 (!%p3725_p6), %v3730_v47  ;;  %v4513_v54 = vld [vmem:[%s5363_s4 + $0x158] sm:$0xff] (!%p3725_p6)   ;;  %v4516_v57 = vld [vmem:[%s5363_s4 + $0x120] sm:$0xff] (!%p3725_p6)   ;;  %v2533_v50 = vshrl.u32 (!%p3725_p6), %v2532_v49, 7 }
 0x155   : > { %2707 = vmatprep.mubr.bf16.mxu1 (!%p3725_p6), %v4641_v28  ;;  %v4557_v49 = vld [vmem:[%s5367_s8] sm:$0xff] (!%p3725_p6)  }
 0x156   : > { %4094 = vmatpush3.bf16.msra.mxu0 (!%p3725_p6), %v4510_v51  ;;  %v2534_v51 = vsub.s32 (!%p3725_p6), 0, %v2533_v50 }
 0x157   : > { %4095 = vmatprep.subr.bf16.mxu0 (!%p3725_p6), %v4511_v52  ;;  %v2530_v52 = vld [vmem:[%s5366_s7] sm:$0x7] (!%p3725_p6) }
 0x15a   : > { %4096 = vmatpush3.bf16.msra.mxu0 (!%p3725_p6), %v4512_v53  ;;  %v2538_v53 = vsub.s32 (!%p3725_p6), 1, %v2533_v50 }
 0x15b   : > { %4097 = vmatprep.subr.bf16.mxu0 (!%p3725_p6), %v4513_v54  ;;  %v2535_v54 = vrot.slane (!%p3725_p6), %v2530_v52, %v2534_v51  ;;  %v4559_v51 = vld [vmem:[%s5367_s8 + $0x10] sm:$0xff] (!%p3725_p6)  }
 0x15e   : > { %4098 = vmatpush3.bf16.msra.mxu0 (!%p3725_p6), %v4514_v55  ;;  %v2542_v55 = vsub.s32 (!%p3725_p6), 2, %v2533_v50  ;;  %v4558_v50 = vld [vmem:[%s5367_s8 + $0x8] sm:$0xff] (!%p3725_p6)  }
 0x15f   : > { %4099 = vmatprep.subr.bf16.mxu0 (!%p3725_p6), %v4515_v56  ;;  %v2539_v56 = vrot.slane (!%p3725_p6), %v2530_v52, %v2538_v53  ;;  %v4561_v53 = vld [vmem:[%s5367_s8 + $0x20] sm:$0xff] (!%p3725_p6)  }
 0x162   : > { %4100 = vmatpush3.bf16.msra.mxu0 (!%p3725_p6), %v4516_v57 }
 0x163   : > { %4101 = vmatprep.subr.bf16.mxu0 (!%p3725_p6), %v4517_v58 }
 0x16e   : > { %v4019_v60 = vpop.f32.mrb[12].mxu0 }
 0x16f   : > { %v4041_v61 = vpop.f32.mrb[12].mxu1  ;;  %v4020_v62 = vpop.f32.mrb[13].mxu0 }
 0x170   : > { %v4021_v63 = vadd.f32 %v4020_v62, %v4019_v60  ;;  %v4042_v0 = vpop.f32.mrb[13].mxu1  ;;  %v4022_v1 = vpop.f32.mrb[14].mxu0  ;;  %v4519_v62 = vld [vmem:[%s5363_s4 + $0x170] sm:$0xff] (!%p3725_p6)  }
 0x171   : > { %v4043_v2 = vadd.f32 %v4042_v0, %v4041_v61  ;;  %v4044_v3 = vpop.f32.mrb[14].mxu1  ;;  %v4023_v4 = vpop.f32.mrb[15].mxu0  ;;  %v4518_v61 = vld [vmem:[%s5363_s4 + $0x128] sm:$0xff] (!%p3725_p6)   ;;  %v4521_v0 = vld [vmem:[%s5363_s4 + $0x178] sm:$0xff] (!%p3725_p6)  }
 0x172   : > { %v1902_v5 = vadd.f32 %v4021_v63, %v1862_v59  ;;  %v4045_v6 = vpop.f32.mrb[15].mxu1  ;;  %1952 = sbr.rel (%p3725_p6) target bundleno = 3088 (0xc10), region = 92  ;;  %v1964_v59 = vld [vmem:[%s5360_s1 + $0x10] sm:$0xff] (!%p3725_p6)  ;;  %4102 = vmatpush3.bf16.msra.mxu0 (!%p3725_p6), %v4518_v61  ;;  %v4522_v1 = vld [vmem:[%s5363_s4 + $0x138] sm:$0xff] (!%p3725_p6)   ;;  %v4525_v3 = vld [vmem:[%s5365_s6] ss:$12 sps:$4 sm:$0xff] (!%p3725_p6)  }
 0x173   : > { %v3733_v60 = vcombine.high (!%p3725_p6), %v1964_v59, %v1964_v59  ;;  %v4520_v63 = vld [vmem:[%s5363_s4 + $0x130] sm:$0xff] (!%p3725_p6)   ;;  %4103 = vmatprep.subr.bf16.mxu0 (!%p3725_p6), %v4519_v62  ;;  %v2543_v62 = vrot.slane (!%p3725_p6), %v2530_v52, %v2542_v55  ;;  %v4560_v52 = vld [vmem:[%s5367_s8 + $0x18] sm:$0xff] (!%p3725_p6)  }
 0x174   : > { %v1942_v8 = vadd.f32 %v4043_v2, %v1902_v5  ;;  %v3732_v2 = vcombine.low (!%p3725_p6), %v1964_v59, %v1964_v59  ;;  %v4527_v4 = vld [vmem:[%s5365_s6 + $0x4] ss:$12 sps:$4 sm:$0xff] (!%p3725_p6)   ;;  %v4640_v5 = vmov (!%p3725_p6), 0.0   ;;  %v4528_v6 = vld [vmem:[%s5365_s6 + $0x8] ss:$12 sps:$4 sm:$0xff] (!%p3725_p6)  }
 0x175   : > { %2489 = vmatprep.mubr.bf16.mxu0 (!%p3725_p6), %v3733_v60  ;;  %2675 = vmatprep.subr.bf16.mxu1 (!%p3725_p6), %v4527_v4  ;;  %v4563_v55 = vld [vmem:[%s5367_s8 + $0x30] sm:$0xff] (!%p3725_p6)  }
 0x176   : > { %v1947_v9 = vadd.f32 %v1942_v8, %v538_v7  ;;  %4104 = vmatpush3.bf16.msra.mxu0 (!%p3725_p6), %v4520_v63  ;;  %v4531_v7 = vld [vmem:[%s5365_s6 + $0x1c] ss:$12 sps:$4 sm:$0xff] (!%p3725_p6)   ;;  %2676 = vmatpush1.bf16.msra.mxu1 (!%p3725_p6), %v4525_v3  ;;  %v4529_v8 = vld [vmem:[%s5365_s6 + $0x18] ss:$12 sps:$4 sm:$0xff] (!%p3725_p6)  }
 0x177   : > { %4105 = vmatprep.subr.bf16.mxu0 (!%p3725_p6), %v4521_v0  ;;  %2677 = vmatprep.subr.bf16.mxu1 (!%p3725_p6), %v4531_v7 }
 0x178   : > { %1948 = vst [vmem:[#allocation2] sm:$0xff] %v1947_v9  ;;  %v4532_v9 = vld [vmem:[%s5365_s6 + $0x20] ss:$12 sps:$4 sm:$0xff] (!%p3725_p6)  }
 0x17a   : > { %4106 = vmatpush3.bf16.msra.mxu0 %v4522_v1  ;;  %2678 = vmatpush1.bf16.msra.mxu1 %v4529_v8 }
 0x17b   : > { %4171 = vmatprep.subr.bf16.mxu0 %v4640_v5  ;;  %2679 = vmatprep.subr.bf16.mxu1 %v4535_v10 }
 0x17d   : > { %2490 = vmatmul.mubr.bf16.vlgmr.msra.gmra.mrb[4].mxu0 %v3732_v2 }
 0x17e   : > { %4172 = vmatpush3.bf16.msra.mxu0 %v4528_v6  ;;  %2680 = vmatpush1.bf16.msra.mxu1 %v4533_v11 }
 0x17f   : > { %4173 = vmatprep.subr.bf16.mxu0 %v4640_v5  ;;  %2681 = vmatprep.subr.bf16.mxu1 %v4539_v13 }
 0x180   : > { %4187 = vmatprep.mubr.msk.bf16.mxu0 %vm4642_vm0, %v4640_v5 }
 0x182   : > { %4174 = vmatpush3.bf16.msra.mxu0 %v4532_v9  ;;  %2682 = vmatpush1.bf16.msra.mxu1 %v4537_v14 }
 0x183   : > { %4175 = vmatprep.subr.bf16.mxu0 %v4640_v5  ;;  %2683 = vmatprep.subr.bf16.mxu1 %v4543_v16 }
 0x186   : > { %4176 = vmatpush3.bf16.msra.mxu0 %v4536_v12  ;;  %2684 = vmatpush1.bf16.msra.mxu1 %v4541_v17 }
 0x187   : > { %4177 = vmatprep.subr.bf16.mxu0 %v4640_v5  ;;  %2685 = vmatprep.subr.bf16.mxu1 %v4547_v19 }
 0x18a   : > { %4178 = vmatpush3.bf16.msra.mxu0 %v4540_v15  ;;  %2686 = vmatpush1.bf16.msra.mxu1 %v4545_v20 }
 0x18b   : > { %4179 = vmatprep.subr.bf16.mxu0 %v4640_v5  ;;  %2687 = vmatprep.subr.bf16.mxu1 %v4551_v22 }
 0x18e   : > { %4180 = vmatpush3.bf16.msra.mxu0 %v4544_v18  ;;  %2688 = vmatpush1.bf16.msra.mxu1 %v4549_v23 }
 0x18f   : > { %4181 = vmatprep.subr.bf16.mxu0 %v4640_v5  ;;  %2689 = vmatprep.subr.bf16.mxu1 %v4555_v25 }
 0x192   : > { %4182 = vmatpush3.bf16.msra.mxu0 %v4548_v21  ;;  %2690 = vmatpush1.bf16.msra.mxu1 %v4553_v26 }
 0x193   : > { %4183 = vmatprep.subr.bf16.mxu0 %v4640_v5  ;;  %4191 = vmatprep.subr.bf16.mxu1 %v4640_v5 }
 0x196   : > { %4184 = vmatpush3.bf16.msra.mxu0 %v4552_v24 }
 0x197   : > { %4185 = vmatprep.subr.bf16.mxu0 %v4640_v5 }
 0x19a   : > { %4186 = vmatpush3.bf16.msra.mxu0 %v4556_v27 }
 0x19b   : > { %4215 = vmatprep.subr.bf16.mxu0 %v4640_v5 }
 0x20d   : > { %v4063_v29 = vpop.f32.mrb[0].mxu0 }
 0x20e   : > { %v4064_v31 = vpop.f32.mrb[1].mxu0 }
 0x20f   : > { %v4065_v32 = vadd.f32 %v4064_v31, %v4063_v29  ;;  %v4066_v33 = vpop.f32.mrb[2].mxu0 }
 0x210   : > { %v4067_v35 = vpop.f32.mrb[3].mxu0 }
 0x211   : > { %v2412_v37 = vadd.f32 %v4065_v32, %v3727_v30 }
 0x227   : > { %v4085_v34 = vpop.f32.mrb[0].mxu1 }
 0x228   : > { %v4086_v36 = vpop.f32.mrb[1].mxu1 }
 0x229   : > { %v4087_v38 = vadd.f32 %v4086_v36, %v4085_v34  ;;  %v4088_v39 = vpop.f32.mrb[2].mxu1 }
 0x22a   : > { %v4089_v40 = vpop.f32.mrb[3].mxu1 }
 0x22b   : > { %v2452_v41 = vadd.f32 %v4087_v38, %v2412_v37 }
 0x250   : > { %v4107_v42 = vpop.f32.mrb[4].mxu0 }
 0x251   : > { %v4108_v43 = vpop.f32.mrb[5].mxu0 }
 0x252   : > { %v4109_v44 = vadd.f32 %v4108_v43, %v4107_v42  ;;  %v4110_v45 = vpop.f32.mrb[6].mxu0 }
 0x253   : > { %v4111_v46 = vpop.f32.mrb[7].mxu0 }
 0x254   : > { %v2492_v47 = vadd.f32 %v4109_v44, %v2452_v41 }
 0x256   : > { %v2497_v48 = vpack.c.bf16 %v2492_v47, %v2492_v47 }
 0x258   : > { %2708 = vmatmul.mubr.bf16.vlgmr.msra.gmra.mrb[4].mxu1 %v2497_v48  ;;  %4188 = vmatmul.mubr.bf16.vlgmr.msra.gmra.mrb[8].mxu0 %v2497_v48 }
 0x259   : > { %4193 = vmatprep.mubr.msk.bf16.mxu1 %vm4642_vm0, %v4640_v5  ;;  %4231 = vmatprep.mubr.msk.bf16.mxu0 %vm4642_vm0, %v4640_v5 }
 0x25a   : > { %4216 = vmatpush3.bf16.msra.mxu0 %v4557_v49 }
 0x25b   : > { %4217 = vmatprep.subr.bf16.mxu0 %v4640_v5 }
 0x25e   : > { %4218 = vmatpush3.bf16.msra.mxu0 %v4558_v50 }
 0x25f   : > { %4219 = vmatprep.subr.bf16.mxu0 %v4640_v5 }
 0x262   : > { %4220 = vmatpush3.bf16.msra.mxu0 %v4559_v51  ;;  %v4591_v51 = vld [vmem:[%s5373_s14 + $0x10] sm:$0xff]  }
 0x263   : > { %4221 = vmatprep.subr.bf16.mxu0 %v4640_v5 }
 0x266   : > { %4222 = vmatpush3.bf16.msra.mxu0 %v4560_v52  ;;  %v4592_v52 = vld [vmem:[%s5373_s14 + $0x18] sm:$0xff]  }
 0x267   : > { %4223 = vmatprep.subr.bf16.mxu0 %v4640_v5 }
 0x26a   : > { %4224 = vmatpush3.bf16.msra.mxu0 %v4561_v53  ;;  %v3852_v53 = vld [vmem:[%s5372_s13] ss:$0 sm:$0xff] }
 0x26b   : > { %4225 = vmatprep.subr.bf16.mxu0 %v4640_v5 }
 0x32b   : > { %v2709_v57 = vpop.f32.mrb[4].mxu1  ;;  %v2750_v58 = vpop.f32.mrb[8].mxu0 }
 0x32c   : > { %v2710_v59 = vadd.f32 %v2709_v57, %v2535_v54  ;;  %v2711_v60 = vpop.f32.mrb[5].mxu1  ;;  %v4189_v61 = vpop.f32.mrb[9].mxu0  ;;  %v2751_v7 = vadd.f32 %v2750_v58, %v2543_v62  ;;  %v4562_v54 = vld [vmem:[%s5367_s8 + $0x28] sm:$0xff]   ;;  %v4566_v57 = vld [vmem:[%s5369_s10 + $0x40] sm:$0xff]  }
 0x32d   : > { %v2712_v63 = vadd.f32 %v2711_v60, %v2539_v56  ;;  %v2713_v0 = vpop.f32.mrb[6].mxu1  ;;  %v2753_v1 = vpop.f32.mrb[10].mxu0  ;;  %4226 = vmatpush3.bf16.msra.mxu0 %v4562_v54  ;;  %v4564_v56 = vld [vmem:[%s5367_s8 + $0x38] sm:$0xff]   ;;  %v4568_v58 = vld [vmem:[%s5369_s10 + $0x48] sm:$0xff]   ;;  %v4570_v60 = vld [vmem:[%s5369_s10 + $0x50] sm:$0xff]  }
 0x32e   : > { %v2714_v2 = vpop.f32.mrb[7].mxu1  ;;  %v4190_v3 = vpop.f32.mrb[11].mxu0  ;;  %v2756_v4 = vmul.f32 0.125, %v2710_v59  ;;  %v2759_v10 = vpack.c.bf16 %v2751_v7, %v2751_v7  ;;  %4227 = vmatprep.subr.bf16.mxu0 %v4640_v5  ;;  %v4572_v0 = vld [vmem:[%s5369_s10 + $0x58] sm:$0xff]   ;;  %v4574_v1 = vld [vmem:[%s5369_s10 + $0x60] sm:$0xff]  }
 0x32f   : > { %v2758_v6 = vpack.c.bf16 %v2712_v63, %v2712_v63  ;;  %v4576_v2 = vld [vmem:[%s5369_s10 + $0x68] sm:$0xff]   ;;  %v4578_v3 = vld [vmem:[%s5369_s10 + $0x70] sm:$0xff]   ;;  %v4565_v7 = vld [vmem:[%s5369_s10] sm:$0xff]  }
 0x330   : > { %v2757_v9 = vpack.c.bf16 %v2756_v4, %v2756_v4  ;;  %v2825_v11 = vsel %vm2823_vm2, %v2759_v10, 0 }
 0x331   : > { %v2765_v8 = vsel %vm2760_vm1, %v2758_v6, 0  ;;  %2871 = vrot.lane.b32.xlu1 %v2758_v6, %s4643_s17  ;;  %4228 = vmatpush3.bf16.msra.mxu0 %v4563_v55 }
 0x332   : > { %4192 = vmatpush3.bf16.xpose.msra.mxu1 %v2765_v8  ;;  %4229 = vmatprep.subr.bf16.mxu0 %v4640_v5 }
 0x333   : > { %4197 = vmatprep.subr.bf16.mxu1 %v4640_v5 }
 0x335   : > { %2868 = vrot.lane.b32.xlu1 %v2757_v9, %s4643_s17  ;;  %4230 = vmatpush3.bf16.msra.mxu0 %v4564_v56 }
 0x336   : > { %4255 = vmatprep.subr.bf16.mxu0 %v4640_v5 }
 0x339   : > { %4194 = vmatmul.mubr.msk.bf16.vlgmr.msra.gmra.mrb[8].mxu1 %vm2760_vm1, %v2757_v9  ;;  %v4567_v9 = vld [vmem:[%s5369_s10 + $0x8] sm:$0xff]  }
 0x33a   : > { %4198 = vmatpush3.bf16.msra.mxu1 %v2825_v11  ;;  %4199 = vmatprep.mubr.msk.bf16.mxu1 %vm4642_vm0, %v4640_v5  ;;  %v4571_v11 = vld [vmem:[%s5369_s10 + $0x18] sm:$0xff]  }
 0x33b   : > { %4203 = vmatprep.subr.bf16.mxu1 %v4640_v5 }
 0x3a3   : > { %v2872_v25 = vpop.permute.xlu1 %2871 }
 0x3a4   : > { %v2877_v27 = vsel %vm2760_vm1, %v2872_v25, 0 }
 0x3a7   : > { %v2869_v28 = vpop.permute.xlu1 %2868 }
 0x40c   : > { %v2801_v12 = vpop.f32.mrb[8].mxu1 }
 0x40d   : > { %v4195_v13 = vpop.f32.mrb[9].mxu1  ;;  %v2808_v14 = vsel %vm2807_vm3, %v2801_v12, -inf }
 0x40e   : > { %2809 = vmax.xlane.f32.xlu0 %v2808_v14  ;;  %v2804_v15 = vpop.f32.mrb[10].mxu1  ;;  %v4575_v13 = vld [vmem:[%s5369_s10 + $0x28] sm:$0xff]   ;;  %v4577_v14 = vld [vmem:[%s5369_s10 + $0x30] sm:$0xff]  }
 0x40f   : > { %v4196_v16 = vpop.f32.mrb[11].mxu1  ;;  %v4579_v15 = vld [vmem:[%s5369_s10 + $0x38] sm:$0xff]  }
 0x410   : > { %v1953_v16 = vld [vmem:[#allocation2] sm:$0xff] }
 0x49b   : > { %v2810_v17 = vpop.xlane.xlu0 %2809 }
 0x49c   : > { %v2811_v18 = vsub.f32 %v2801_v12, %v2810_v17  ;;  %v4573_v12 = vld [vmem:[%s5369_s10 + $0x20] sm:$0xff]  }
 0x49d   : > { %v3726_v17 = vld [vmem:[%s5362_s3] ss:$0 sm:$0xff] }
 0x49e   : > { %v2812_v19 = vmul.f32 1.442695, %v2811_v18  ;;  %v1961_v18 = vadd.f32 %v3726_v17, %v1953_v16 }
 0x4a0   : > { %4593 = vpow2.f32 %v2812_v19  ;;  %v4580_v19 = vld [vmem:[%s5369_s10 + $0x78] sm:$0xff]  }
 0x4aa   : > { %v4594_v20 = vpop.eup %4593 }
 0x4ab   : > { %v2814_v21 = vsel %vm2807_vm3, %v4594_v20, 0.0 }
 0x4ac   : > { %2815 = vadd.xlane.f32.xlu0 %v2814_v21  ;;  %v3810_v21 = vld [vmem:[%s5368_s9] ss:$0 sm:$0xff] }
 0x539   : > { %v2816_v22 = vpop.xlane.xlu0 %2815 }
 0x53a   : > { %4595 = vrcp.f32 %v2816_v22 }
 0x544   : > { %v4596_v23 = vpop.eup %4595 }
 0x545   : > { %v2818_v24 = vmul.f32 %v4596_v23, %v4594_v20  ;;  %v3097_v20 = vpack.c.bf16 %v1961_v18, %v1961_v18 }
 0x547   : > { %v2819_v26 = vpack.c.bf16 %v2818_v24, %v2818_v24 }
 0x549   : > { %4200 = vmatmul.mubr.msk.bf16.vlgmr.msra.gmra.mrb[12].mxu1 %vm2807_vm3, %v2819_v26  ;;  %v4581_v26 = vld [vmem:[%s5371_s12] sm:$0xff]  }
 0x54a   : > { %4204 = vmatpush3.bf16.xpose.msra.mxu1 %v2877_v27  ;;  %4205 = vmatprep.mubr.msk.bf16.mxu1 %vm4642_vm0, %v4640_v5 }
 0x54b   : > { %4209 = vmatprep.subr.bf16.mxu1 %v4640_v5 }
 0x551   : > { %4206 = vmatmul.mubr.msk.bf16.vlgmr.msra.gmra.mrb[16].mxu1 %vm2760_vm1, %v2869_v28 }
 0x552   : > { %4211 = vmatprep.mubr.msk.bf16.mxu1 %vm4642_vm0, %v4640_v5 }
 0x61c   : > { %v5156_v29 = vpop.f32.mrb[12].mxu1 }
 0x61d   : > { %v4201_v30 = vpop.f32.mrb[13].mxu1 }
 0x61e   : > { %v2864_v31 = vpop.f32.mrb[14].mxu1  ;;  %v4583_v30 = vld [vmem:[%s5371_s12 + $0x10] sm:$0xff]  }
 0x61f   : > { %v4202_v32 = vpop.f32.mrb[15].mxu1  ;;  %v4584_v31 = vld [vmem:[%s5371_s12 + $0x18] sm:$0xff]  }
 0x620   : > { %v4585_v32 = vld [vmem:[%s5371_s12 + $0x20] sm:$0xff]  }
 0x624   : > { %v2913_v33 = vpop.f32.mrb[16].mxu1 }
 0x625   : > { %v4207_v34 = vpop.f32.mrb[17].mxu1  ;;  %v2919_v35 = vsel %vm2807_vm3, %v2913_v33, -inf }
 0x626   : > { %2920 = vmax.xlane.f32.xlu0 %v2919_v35  ;;  %v2916_v36 = vpop.f32.mrb[18].mxu1 }
 0x627   : > { %v4208_v37 = vpop.f32.mrb[19].mxu1 }
 0x63c   : > { %2932 = vrot.lane.b32.xlu0 %v2759_v10, %s4643_s17  ;;  %v4569_v10 = vld [vmem:[%s5369_s10 + $0x10] sm:$0xff]  }
 0x6b3   : > { %v2921_v38 = vpop.xlane.xlu0 %2920 }
 0x6b4   : > { %v2922_v39 = vsub.f32 %v2913_v33, %v2921_v38  ;;  %v4586_v33 = vld [vmem:[%s5371_s12 + $0x28] sm:$0xff]   ;;  %v4587_v38 = vld [vmem:[%s5371_s12 + $0x30] sm:$0xff]  }
 0x6b6   : > { %v2923_v40 = vmul.f32 1.442695, %v2922_v39  ;;  %v4588_v39 = vld [vmem:[%s5371_s12 + $0x38] sm:$0xff]  }
 0x6b7   : > { %v2933_v41 = vpop.permute.xlu0 %2932 }
 0x6b8   : > { %4597 = vpow2.f32 %v2923_v40  ;;  %v2938_v42 = vsel %vm2823_vm2, %v2933_v41, 0  ;;  %v4589_v40 = vld [vmem:[%s5373_s14] sm:$0xff]   ;;  %v4590_v41 = vld [vmem:[%s5373_s14 + $0x8] sm:$0xff]  }
 0x6b9   : > { %4210 = vmatpush3.bf16.msra.mxu1 %v2938_v42 }
 0x6ba   : > { %4235 = vmatprep.subr.bf16.mxu1 %v4640_v5 }
 0x6c2   : > { %v4598_v43 = vpop.eup %4597 }
 0x6c3   : > { %v2925_v44 = vsel %vm2807_vm3, %v4598_v43, 0.0 }
 0x6c4   : > { %2926 = vadd.xlane.f32.xlu1 %v2925_v44 }
 0x751   : > { %v2927_v45 = vpop.xlane.xlu1 %2926 }
 0x752   : > { %4599 = vrcp.f32 %v2927_v45 }
 0x75c   : > { %v4600_v46 = vpop.eup %4599 }
 0x75d   : > { %v2929_v47 = vmul.f32 %v4600_v46, %v4598_v43  ;;  %v3851_v43 = vld [vmem:[%s5370_s11] ss:$0 sm:$0xff] }
 0x75f   : > { %v2930_v48 = vpack.c.bf16 %v2929_v47, %v2929_v47 }
 0x761   : > { %4212 = vmatmul.mubr.msk.bf16.vlgmr.msra.gmra.mrb[20].mxu1 %vm2807_vm3, %v2930_v48 }
 0x762   : > { %4251 = vmatprep.mubr.msk.bf16.mxu1 %vm4642_vm0, %v4640_v5  ;;  %4236 = vmatpush3.bf16.msra.mxu1 %v4566_v57 }
 0x763   : > { %4237 = vmatprep.subr.bf16.mxu1 %v4640_v5 }
 0x766   : > { %4238 = vmatpush3.bf16.msra.mxu1 %v4568_v58 }
 0x767   : > { %4239 = vmatprep.subr.bf16.mxu1 %v4640_v5 }
 0x76a   : > { %4240 = vmatpush3.bf16.msra.mxu1 %v4570_v60 }
 0x76b   : > { %4241 = vmatprep.subr.bf16.mxu1 %v4640_v5 }
 0x76e   : > { %4242 = vmatpush3.bf16.msra.mxu1 %v4572_v0 }
 0x76f   : > { %4243 = vmatprep.subr.bf16.mxu1 %v4640_v5 }
 0x772   : > { %4244 = vmatpush3.bf16.msra.mxu1 %v4574_v1 }
 0x773   : > { %4245 = vmatprep.subr.bf16.mxu1 %v4640_v5 }
 0x776   : > { %4246 = vmatpush3.bf16.msra.mxu1 %v4576_v2 }
 0x777   : > { %4247 = vmatprep.subr.bf16.mxu1 %v4640_v5 }
 0x77a   : > { %4248 = vmatpush3.bf16.msra.mxu1 %v4578_v3 }
 0x77b   : > { %4249 = vmatprep.subr.bf16.mxu1 %v4640_v5 }
 0x77e   : > { %4250 = vmatpush3.bf16.msra.mxu1 %v4580_v19 }
 0x77f   : > { %4275 = vmatprep.subr.bf16.mxu1 %v4640_v5 }
 0x834   : > { %v2974_v59 = vpop.f32.mrb[20].mxu1 }
 0x835   : > { %2981 = vrot.lane.b32.xlu0 %v2974_v59, %s4643_s17  ;;  %v4213_v61 = vpop.f32.mrb[21].mxu1 }
 0x836   : > { %v2977_v62 = vpop.f32.mrb[22].mxu1 }
 0x837   : > { %v4214_v63 = vpop.f32.mrb[23].mxu1 }
 0x8a7   : > { %v2982_v4 = vpop.permute.xlu0 %2981 }
 0x8a8   : > { %v2984_v6 = vsel %vm2760_vm1, %v5156_v29, %v2982_v4  ;;  %v4582_v29 = vld [vmem:[%s5371_s12 + $0x8] sm:$0xff]  }
 0x8a9   : > { %v2985_v8 = vpack.c.bf16 %v2984_v6, %v2984_v6 }
 0x8ab   : > { %4232 = vmatmul.mubr.bf16.vlgmr.msra.gmra.mrb[12].mxu0 %v2985_v8 }
 0x8ac   : > { %4256 = vmatpush3.bf16.msra.mxu0 %v4565_v7  ;;  %4271 = vmatprep.mubr.msk.bf16.mxu0 %vm4642_vm0, %v4640_v5 }
 0x8ad   : > { %4257 = vmatprep.subr.bf16.mxu0 %v4640_v5 }
 0x8b0   : > { %4258 = vmatpush3.bf16.msra.mxu0 %v4567_v9 }
 0x8b1   : > { %4259 = vmatprep.subr.bf16.mxu0 %v4640_v5 }
 0x8b4   : > { %4260 = vmatpush3.bf16.msra.mxu0 %v4569_v10 }
 0x8b5   : > { %4261 = vmatprep.subr.bf16.mxu0 %v4640_v5 }
 0x8b8   : > { %4262 = vmatpush3.bf16.msra.mxu0 %v4571_v11 }
 0x8b9   : > { %4263 = vmatprep.subr.bf16.mxu0 %v4640_v5 }
 0x8bc   : > { %4264 = vmatpush3.bf16.msra.mxu0 %v4573_v12 }
 0x8bd   : > { %4265 = vmatprep.subr.bf16.mxu0 %v4640_v5 }
 0x8c0   : > { %4266 = vmatpush3.bf16.msra.mxu0 %v4575_v13 }
 0x8c1   : > { %4267 = vmatprep.subr.bf16.mxu0 %v4640_v5 }
 0x8c4   : > { %4268 = vmatpush3.bf16.msra.mxu0 %v4577_v14 }
 0x8c5   : > { %4269 = vmatprep.subr.bf16.mxu0 %v4640_v5 }
 0x8c8   : > { %4270 = vmatpush3.bf16.msra.mxu0 %v4579_v15 }
 0x8c9   : > { %4295 = vmatprep.subr.bf16.mxu0 %v4640_v5 }
 0x8cb   : > { %4272 = vmatmul.mubr.bf16.vlgmr.msra.gmra.mrb[16].mxu0 %v3097_v20 }
 0x8cc   : > { %4303 = vmatprep.mubr.msk.bf16.mxu0 %vm4642_vm0, %v4640_v5  ;;  %4296 = vmatpush3.bf16.msra.mxu0 %v4589_v40 }
 0x8cd   : > { %4297 = vmatprep.subr.bf16.mxu0 %v4640_v5 }
 0x8d0   : > { %4298 = vmatpush3.bf16.msra.mxu0 %v4590_v41 }
 0x8d1   : > { %4299 = vmatprep.subr.bf16.mxu0 %v4640_v5 }
 0x8d4   : > { %4300 = vmatpush3.bf16.msra.mxu0 %v4591_v51 }
 0x8d5   : > { %4301 = vmatprep.subr.bf16.mxu0 %v4640_v5 }
 0x8d8   : > { %4302 = vmatpush3.bf16.msra.mxu0 %v4592_v52 }
 0x97e   : > { %v3091_v22 = vpop.f32.mrb[12].mxu0 }
 0x97f   : > { %v3092_v23 = vadd.f32 %v3810_v21, %v3091_v22  ;;  %v4233_v24 = vpop.f32.mrb[13].mxu0 }
 0x980   : > { %v3094_v25 = vpop.f32.mrb[14].mxu0 }
 0x981   : > { %v3114_v27 = vpack.c.bf16 %v3092_v23, %v3092_v23  ;;  %v4234_v28 = vpop.f32.mrb[15].mxu0 }
 0x983   : > { %4252 = vmatmul.mubr.bf16.vlgmr.msra.gmra.mrb[24].mxu1 %v3114_v27 }
 0x984   : > { %4276 = vmatpush3.bf16.msra.mxu1 %v4581_v26  ;;  %4291 = vmatprep.mubr.msk.bf16.mxu1 %vm4642_vm0, %v4640_v5 }
 0x985   : > { %4277 = vmatprep.subr.bf16.mxu1 %v4640_v5 }
 0x988   : > { %4278 = vmatpush3.bf16.msra.mxu1 %v4582_v29 }
 0x989   : > { %4279 = vmatprep.subr.bf16.mxu1 %v4640_v5 }
 0x98c   : > { %4280 = vmatpush3.bf16.msra.mxu1 %v4583_v30 }
 0x98d   : > { %4281 = vmatprep.subr.bf16.mxu1 %v4640_v5 }
 0x990   : > { %4282 = vmatpush3.bf16.msra.mxu1 %v4584_v31 }
 0x991   : > { %4283 = vmatprep.subr.bf16.mxu1 %v4640_v5 }
 0x994   : > { %4284 = vmatpush3.bf16.msra.mxu1 %v4585_v32 }
 0x995   : > { %4285 = vmatprep.subr.bf16.mxu1 %v4640_v5 }
 0x998   : > { %4286 = vmatpush3.bf16.msra.mxu1 %v4586_v33 }
 0x999   : > { %4287 = vmatprep.subr.bf16.mxu1 %v4640_v5 }
 0x99c   : > { %4288 = vmatpush3.bf16.msra.mxu1 %v4587_v38 }
 0x99d   : > { %4289 = vmatprep.subr.bf16.mxu1 %v4640_v5  ;;  %v3861_v5 = vld [vmem:[%s5374_s15] ss:$0 sm:$0xff] }
 0x99e   : > { %v3302_v34 = vpop.f32.mrb[16].mxu0 }
 0x99f   : > { %v4273_v35 = vpop.f32.mrb[17].mxu0 }
 0x9a0   : > { %v3305_v36 = vpop.f32.mrb[18].mxu0  ;;  %4290 = vmatpush3.bf16.msra.mxu1 %v4588_v39 }
 0x9a1   : > { %v4274_v37 = vpop.f32.mrb[19].mxu0 }
 0xa56   : > { %v3214_v42 = vpop.f32.mrb[24].mxu1 }
 0xa57   : > { %v3303_v44 = vadd.f32 %v3302_v34, %v3214_v42  ;;  %v4253_v45 = vpop.f32.mrb[25].mxu1 }
 0xa58   : > { %v3217_v46 = vpop.f32.mrb[26].mxu1 }
 0xa59   : > { %v3315_v47 = vadd.f32 %v3851_v43, %v3303_v44  ;;  %v4254_v48 = vpop.f32.mrb[27].mxu1 }
 0xa5b   : > { %v3316_v49 = vmax.f32 %v3315_v47, 0.0 }
 0xa5d   : > { %v3317_v50 = vpack.c.bf16 %v3316_v49, %v3316_v49 }
 0xa5f   : > { %4292 = vmatmul.mubr.bf16.vlgmr.msra.gmra.mrb[28].mxu1 %v3317_v50 }
 0xb32   : > { %v3423_v54 = vpop.f32.mrb[28].mxu1 }
 0xb33   : > { %v3424_v55 = vadd.f32 %v3852_v53, %v3423_v54  ;;  %v4293_v56 = vpop.f32.mrb[29].mxu1 }
 0xb34   : > { %v3426_v57 = vpop.f32.mrb[30].mxu1 }
 0xb35   : > { %v3429_v58 = vmax.f32 %v3424_v55, 0.0  ;;  %v4294_v59 = vpop.f32.mrb[31].mxu1 }
 0xb37   : > { %v3430_v60 = vpack.c.bf16 %v3429_v58, %v3429_v58 }
 0xb39   : > { %4304 = vmatmul.mubr.msk.bf16.vlgmr.msra.gmra.mrb[20].mxu0 %vm2760_vm1, %v3430_v60 }
 0xc0c   : > { %v3507_v61 = vpop.f32.mrb[20].mxu0 }
 0xc0d   : > { %v3508_v62 = vadd.f32 %v3861_v5, %v3507_v61  ;;  %v4305_v63 = vpop.f32.mrb[21].mxu0 }
 0xc0e   : > { %v3510_v0 = vpop.f32.mrb[22].mxu0 }
 0xc0f   : > { %3513 = vst [vmem:[#allocation3] sm:$0xff] %v3508_v62  ;;  %v4306_v1 = vpop.f32.mrb[23].mxu0 }
 0xc10 PF: > { %p4311_p7 = scmp.eq.s32.totalorder %s4736_s22, 2  ;;  %s4644_s25 = smov [#allocation3]  }
 0xc11   : > { %s3521_s26 = sshll.u32 %s4644_s25, 4  ;;  %s3522_s26 = int_to_ptr.vmem [resolvable:$true] %s3521_s26 }
 0xc12   : > { %s4601_s27 = scalar_lea.vmem %s3522_s26, 128  ;;  %p4608_p11 = scmp.lt.s32.totalorder %s3522_s26, %s3522_s26 }
 0xc13   : > { %p4602_p8 = scmp.ne.s32.totalorder %s3522_s26, %s4601_s27  ;;  %p4609_p12 = scmp.lt.s32.totalorder %s4601_s27, %s4601_s27 }
 0xc15   : > { %p4603_p9 = pnand %p4602_p8, %p4311_p7  ;;  %p4610_p13 = por %p4609_p12, %p4608_p11 }
 0xc17   : > { %p4604_p10 = pneg %p4603_p9 }
 0xc19   : > { %p4611_p0 = pnand %p4610_p13, %p4604_p10 }
 0xc1b   : > { %4614 = shalt.err (!%p4611_p0)
}
 0xc1c   : > { %s4615_s30 = scalar_lea.hbm %s5375_s16, 128 }
 0xc1d   : > { %p4616_p1 = scmp.ne.s32.totalorder %s5375_s16, %s4615_s30  ;;  %p4621_p4 = scmp.lt.u32.totalorder %s4615_s30, %s5375_s16 }
 0xc1f   : > { %p4617_p2 = pnand %p4616_p1, %p4311_p7 }
 0xc21   : > { %p4618_p3 = pneg %p4617_p2 }
 0xc23   : > { %p4623_p5 = pnand %p4621_p4, %p4618_p3 }
 0xc25   : > { %4626 = shalt.err (!%p4623_p5)
}
 0xc26   : > { %4308 = dma.vmem_to_hbm [thread:$0]  (%p4311_p7), %s3522_s26, 128, %s5375_s16, [#allocation4]  }
 0xc27   : > { %4632 = dma.done.wait (%p4311_p7), [#allocation4], 128  }
 0xc28   : > { %4634 = vsyncadd (%p4311_p7), [#allocation4], 4294967168 }
 0xc29 PF: > { %s27_s21 = sadd.s32 1, %s4637_s21  }
 0xc2a   : > { %p24_p6 = scmp.ge.s32.totalorder %s27_s21, 5  }
 0xc2c   :  { %26 = sbr.rel (!%p24_p6) target bundleno = 3 (0x3), region = 123 }
 0xc33   :  { %3534 = vsyncpa [#allocation4], 1 }
 0xc34   :  { %3536 = vsyncpa [#allocation4 + $0x1], 1 }

</bundles_post_ra>
